<compile_context>
chip_gen: v7x
topology: tpu7x:2x2x1
jax: 0.10.0
libtpu: 0.0.40
codegen_flags: <defaults>
</compile_context>

<pallas_src>
import functools

import jax
import jax.numpy as jnp
import numpy as np
from jax import lax
from jax.experimental import pallas as pl
from jax.experimental.pallas import tpu as pltpu

LRELU_SLOPE = 0.1
COMPUTE_DTYPE = jnp.bfloat16   # MXU input / activation storage dtype
TILE_L = 512                   # lane-dense length tile (multiple of 128)
TILE_CO = 128                  # C_out tile when C_out is a multiple of 128
HALO_BLK = 128                 # halo block width; covers dilation*(K-1) <= 128
VMEM_LIMIT = 32 * 1024 * 1024  # explicit scoped-VMEM budget (fits every TPU gen)


def get_padding(kernel_size, dilation=1):
    return int((kernel_size * dilation - dilation) / 2)


# ----------------------------------------------------------------------------
# Pallas kernels
# ----------------------------------------------------------------------------
def _conv1d_kernel(*refs, K, dil, tile_l, slope, fold, has_halo, has_res, has_add):
    """One (batch, L-tile, C_out-tile) block of a stride-1 dilated Conv1d.

    refs = x_main, [x_halo], w, b, [residual], [extra_add], out
      x_main : (1, C_in, tile_l)  or (1, C_in, L_in) when untiled   (bf16)
      x_halo : (1, C_in, HALO_BLK) right halo                        (bf16)
      w      : (tile_co, K*C_in) if fold else (K, tile_co, C_in)     (bf16)
      b      : (tile_co, 1)                                          (f32)
      res    : (1, tile_co, tile_l) structural residual              (bf16)
      add    : (1, tile_co, tile_l) running xs accumulator           (bf16)
      out    : (1, tile_co, tile_l)
    """
    i = 0
    x_ref = refs[i]; i += 1
    h_ref = None
    if has_halo:
        h_ref = refs[i]; i += 1
    w_ref = refs[i]; i += 1
    b_ref = refs[i]; i += 1
    r_ref = None
    if has_res:
        r_ref = refs[i]; i += 1
    a_ref = None
    if has_add:
        a_ref = refs[i]; i += 1
    o_ref = refs[i]

    x = x_ref[0]                                        # (C_in, window)
    if has_halo:
        x = jnp.concatenate([x, h_ref[0]], axis=-1)     # append right halo
    if slope is not None:
        # leaky_relu fused before the conv (zero padding invariant under lrelu)
        x = jnp.where(x >= 0, x, slope * x)

    if fold:
        # Fold the K taps into one MXU contraction of size K*C_in.
        xs = jnp.concatenate(
            [x[:, k * dil: k * dil + tile_l] for k in range(K)], axis=0)
        acc = jnp.dot(w_ref[...], xs, preferred_element_type=jnp.float32)
    else:
        acc = jnp.dot(w_ref[0], x[:, :tile_l], preferred_element_type=jnp.float32)
        for k in range(1, K):                           # static unroll over taps
            acc = acc + jnp.dot(w_ref[k], x[:, k * dil: k * dil + tile_l],
                                preferred_element_type=jnp.float32)

    acc = acc + b_ref[...]                              # (tile_co, 1) broadcast
    if has_res:
        acc = acc + r_ref[0].astype(jnp.float32)
    if has_add:
        acc = acc + a_ref[0].astype(jnp.float32)
    o_ref[0] = acc.astype(o_ref.dtype)


def _reparam_kernel(m_ref, logs_ref, eps_ref, z_ref):
    z_ref[...] = m_ref[...] + eps_ref[...] * jnp.exp(logs_ref[...])


# ----------------------------------------------------------------------------
# Cached pallas_call builders (one Mosaic compile per unique signature)
# ----------------------------------------------------------------------------
@functools.lru_cache(maxsize=None)
def _build_conv_call(B, C_in, C_out, L_out, K, dil, tile_l, n_l, blk_l_in,
                     has_halo, fold, slope, has_res, has_add, out_dtype):
    tile_co = TILE_CO if (C_out > TILE_CO and C_out % TILE_CO == 0) else C_out
    n_co = C_out // tile_co

    if fold:
        w_spec = pl.BlockSpec((tile_co, K * C_in), lambda bb, t, co: (co, 0))
    else:
        w_spec = pl.BlockSpec((K, tile_co, C_in), lambda bb, t, co: (0, co, 0))

    in_specs = [pl.BlockSpec((1, C_in, blk_l_in), lambda bb, t, co: (bb, 0, t))]
    if has_halo:
        hstep = tile_l // HALO_BLK
        in_specs.append(pl.BlockSpec((1, C_in, HALO_BLK),
                                     lambda bb, t, co: (bb, 0, (t + 1) * hstep)))
    in_specs += [w_spec, pl.BlockSpec((tile_co, 1), lambda bb, t, co: (co, 0))]
    if has_res:
        in_specs.append(pl.BlockSpec((1, tile_co, tile_l),
                                     lambda bb, t, co: (bb, co, t)))
    if has_add:
        in_specs.append(pl.BlockSpec((1, tile_co, tile_l),
                                     lambda bb, t, co: (bb, co, t)))

    kernel = functools.partial(
        _conv1d_kernel, K=K, dil=dil, tile_l=tile_l, slope=slope,
        fold=fold, has_halo=has_halo, has_res=has_res, has_add=has_add)

    call = pl.pallas_call(
        kernel,
        out_shape=jax.ShapeDtypeStruct((B, C_out, L_out), out_dtype),
        grid=(B, n_l, n_co),
        in_specs=in_specs,
        out_specs=pl.BlockSpec((1, tile_co, tile_l), lambda bb, t, co: (bb, co, t)),
        compiler_params=pltpu.CompilerParams(
            dimension_semantics=("parallel", "parallel", "parallel"),
            vmem_limit_bytes=VMEM_LIMIT),
    )
    return jax.jit(call)


@functools.lru_cache(maxsize=None)
def _build_reparam_call(B, C, L, dtype):
    tile = TILE_L if L >= TILE_L else L
    n_l = pl.cdiv(L, tile)
    spec = pl.BlockSpec((1, C, tile), lambda bb, t: (bb, 0, t))
    call = pl.pallas_call(
        _reparam_kernel,
        out_shape=jax.ShapeDtypeStruct((B, C, L), dtype),
        grid=(B, n_l),
        in_specs=[spec] * 3,
        out_specs=spec,
        compiler_params=pltpu.CompilerParams(
            dimension_semantics=("parallel", "parallel"),
            vmem_limit_bytes=VMEM_LIMIT),
    )
    return jax.jit(call)


# ----------------------------------------------------------------------------
# Pallas wrappers
# ----------------------------------------------------------------------------
def conv1d_pallas(x, w, b, *, stride=1, dilation=1, padding=0, pre_lrelu=None,
                  residual=None, extra_add=None, out_dtype=COMPUTE_DTYPE):
    """PyTorch-semantics Conv1d. x:(B,C_in,L), w:(K,C_out,C_in), b:(C_out,)."""
    B, C_in, L = x.shape
    K, C_out, _ = w.shape
    assert (residual is None and extra_add is None) or stride == 1

    x = x.astype(COMPUTE_DTYPE)
    w = w.astype(COMPUTE_DTYPE)
    b = b.astype(jnp.float32)

    if stride > 1:
        # Polyphase split: the strided conv becomes a stride-1 conv over phase-stacked
        # channels (C_in*stride) with ceil(K/stride) taps — no wasted compute/writeback.
        assert dilation == 1
        L_out_s = (L + 2 * padding - K) // stride + 1
        K_eff = -(-K // stride)
        L_ph = L_out_s + K_eff - 1
        target = stride * L_ph
        right = max(0, target - L - padding)
        xp = jnp.pad(x, ((0, 0), (0, 0), (padding, right)))[:, :, :target]
        x = xp.reshape(B, C_in, L_ph, stride).transpose(0, 1, 3, 2) \
              .reshape(B, C_in * stride, L_ph)
        wp = jnp.pad(w, ((0, K_eff * stride - K), (0, 0), (0, 0)))
        w = wp.reshape(K_eff, stride, C_out, C_in).transpose(0, 2, 3, 1) \
              .reshape(K_eff, C_out, C_in * stride)
        C_in, K, L = C_in * stride, K_eff, L_ph
        padding, dilation = 0, 1

    halo = dilation * (K - 1)
    L_out = L + 2 * padding - halo

    if L_out >= TILE_L:
        assert halo <= HALO_BLK, "halo exceeds the 128-wide halo block"
        tile_l, has_halo = TILE_L, True
        n_l = pl.cdiv(L_out, tile_l)
        L_in = n_l * tile_l + HALO_BLK
        blk_l_in = tile_l
    else:  # small length: single tile covering the full (padded) extent
        tile_l, has_halo = L_out, False
        n_l = 1
        L_in = L_out + halo
        blk_l_in = L_in

    x_pad = jnp.pad(x, ((0, 0), (0, 0), (padding, L_in - L - padding)))

    fold = C_in < 128
    if fold:
        w_op = jnp.transpose(w, (1, 0, 2)).reshape(C_out, K * C_in)
    else:
        w_op = w

    call = _build_conv_call(B, C_in, C_out, L_out, K, dilation, tile_l, n_l,
                            blk_l_in, has_halo, fold, pre_lrelu,
                            residual is not None, extra_add is not None, out_dtype)

    inputs = [x_pad]
    if has_halo:
        inputs.append(x_pad)
    inputs += [w_op, b.reshape(C_out, 1)]
    if residual is not None:
        inputs.append(residual.astype(COMPUTE_DTYPE))
    if extra_add is not None:
        inputs.append(extra_add.astype(COMPUTE_DTYPE))
    return call(*inputs)


def reparam_pallas(m, logs, eps):
    B, C, L = m.shape
    return _build_reparam_call(B, C, L, m.dtype)(m, logs, eps)


# ----------------------------------------------------------------------------
# Pure-JAX reference (same bf16-in / f32-accumulate quantization, for checking)
# ----------------------------------------------------------------------------
def conv1d_ref(x, w, b, *, stride=1, dilation=1, padding=0, pre_lrelu=None,
               residual=None, extra_add=None, out_dtype=COMPUTE_DTYPE):
    x = x.astype(COMPUTE_DTYPE)
    w = w.astype(COMPUTE_DTYPE)
    if pre_lrelu is not None:
        x = jnp.where(x >= 0, x, pre_lrelu * x)
    w_oik = jnp.transpose(w, (1, 2, 0))  # (C_out, C_in, K)
    y = lax.conv_general_dilated(
        x, w_oik, window_strides=(stride,), padding=[(padding, padding)],
        rhs_dilation=(dilation,), dimension_numbers=("NCH", "OIH", "NCH"),
        preferred_element_type=jnp.float32)
    y = y + b.astype(jnp.float32)[None, :, None]
    if residual is not None:
        y = y + residual.astype(COMPUTE_DTYPE).astype(jnp.float32)
    if extra_add is not None:
        y = y + extra_add.astype(COMPUTE_DTYPE).astype(jnp.float32)
    return y.astype(out_dtype)


def reparam_ref(m, logs, eps):
    return m + eps * jnp.exp(logs)


# ----------------------------------------------------------------------------
# Encoder forward (structure identical to the PyTorch module)
# ----------------------------------------------------------------------------
def resblock1_forward(rb, x, conv_fn, extra_add=None):
    k = rb["kernel_size"]
    n = len(rb["convs1"])
    for idx, (c1, c2) in enumerate(zip(rb["convs1"], rb["convs2"])):
        add = extra_add if idx == n - 1 else None     # fuse the running xs-sum
        xt = conv_fn(x, c1["w"], c1["b"], dilation=c1["dilation"],
                     padding=get_padding(k, c1["dilation"]), pre_lrelu=LRELU_SLOPE)
        x = conv_fn(xt, c2["w"], c2["b"], dilation=1, padding=get_padding(k, 1),
                    pre_lrelu=LRELU_SLOPE, residual=x, extra_add=add)
    return x


def resblock2_forward(rb, x, conv_fn, extra_add=None):
    k = rb["kernel_size"]
    n = len(rb["convs"])
    for idx, c in enumerate(rb["convs"]):
        add = extra_add if idx == n - 1 else None
        x = conv_fn(x, c["w"], c["b"], dilation=c["dilation"],
                    padding=get_padding(k, c["dilation"]),
                    pre_lrelu=LRELU_SLOPE, residual=x, extra_add=add)
    return x


def encoder_forward(params, h, x, eps, conv_fn, reparam_fn):
    num_kernels = len(h["resblock_kernel_sizes"])
    num_downsamples = len(h["upsample_rates"])
    rb_fn = resblock1_forward if h["resblock"] == "1" else resblock2_forward
    inv_nk = 1.0 / num_kernels

    x = conv_fn(x, params["conv_pre"]["w"], params["conv_pre"]["b"], padding=3)
    for i in range(num_downsamples):
        up = params["ups"][i]
        # The previous stage's `/num_kernels` mean-scale is folded exactly into this
        # conv's weight: conv_{w/nk}(lrelu(xs)) == conv_w(lrelu(xs/nk)) since nk > 0.
        scale = inv_nk if i > 0 else 1.0
        x = conv_fn(x, up["w"] * scale, up["b"], stride=up["stride"],
                    padding=up["padding"], pre_lrelu=LRELU_SLOPE)
        xs = None
        for j in range(num_kernels):
            # The running sum xs is fused into the last conv of each resblock.
            xs = rb_fn(params["resblocks"][i * num_kernels + j], x, conv_fn,
                       extra_add=xs)
        x = xs    # un-scaled sum; the /num_kernels is folded into the next conv
    # F.leaky_relu default slope 0.01, fused into conv_post; conv_post output in f32.
    post_scale = inv_nk if num_downsamples > 0 else 1.0
    x = conv_fn(x, params["conv_post"]["w"] * post_scale, params["conv_post"]["b"],
                padding=3, pre_lrelu=0.01, out_dtype=jnp.float32)
    nm = h["num_mels"]
    m, logs = x[:, :nm, :], x[:, nm:, :]
    # TODO(synk): torch.randn_like has no bitwise JAX equivalent; eps is drawn from
    # jax.random.normal with PRNGKey(0) and passed in (same distribution, different stream).
    z = reparam_fn(m, logs, eps)
    return z, m, logs


# ----------------------------------------------------------------------------
# Deterministic parameter init (shapes follow Encoder.__init__)
# ----------------------------------------------------------------------------
def _init_conv(key, c_out, c_in, k):
    kw, kb = jax.random.split(key)
    return {
        "w": 0.01 * jax.random.normal(kw, (k, c_out, c_in), jnp.float32),  # (K, C_out, C_in)
        "b": 0.01 * jax.random.normal(kb, (c_out,), jnp.float32),
    }


def init_encoder_params(key, h):
    rates, ksizes = h["upsample_rates"], h["upsample_kernel_sizes"]
    uic, L = h["upsample_initial_channel"], len(h["upsample_rates"])
    keys = iter(jax.random.split(key, 256))
    params = {"conv_pre": _init_conv(next(keys), uic // 2 ** L, 1, 7)}

    ups = []
    for i, (u, k) in enumerate(zip(reversed(rates), reversed(ksizes))):
        c_in = uic // 2 ** (L - i)
        c_out = uic // 2 ** (L - i - 1)
        p = _init_conv(next(keys), c_out, c_in, k)
        p["stride"] = u
        p["padding"] = (k - u + 1) // 2
        ups.append(p)
    params["ups"] = ups

    resblocks = []
    for i in range(L, 0, -1):
        ch = uic // 2 ** (i - 1)
        for kk, dd in zip(h["resblock_kernel_sizes"], h["resblock_dilation_sizes"]):
            if h["resblock"] == "1":
                rb = {
                    "kernel_size": kk,
                    "convs1": [dict(_init_conv(next(keys), ch, ch, kk), dilation=d) for d in dd],
                    "convs2": [dict(_init_conv(next(keys), ch, ch, kk), dilation=1) for _ in dd],
                }
            else:
                rb = {
                    "kernel_size": kk,
                    "convs": [dict(_init_conv(next(keys), ch, ch, kk), dilation=d) for d in dd],
                }
            resblocks.append(rb)
    params["resblocks"] = resblocks

    ch = uic  # channels after the last stage
    params["conv_post"] = _init_conv(next(keys), 2 * h["num_mels"], ch, 7)
    return params


# ----------------------------------------------------------------------------
def _to_np(a):
    return np.asarray(jnp.asarray(a, jnp.float32))


def _assert_close(name, got, want, rtol=0.08):
    got, want = _to_np(got), _to_np(want)
    atol = 0.08 * float(np.mean(np.abs(want))) + 1e-6
    np.testing.assert_allclose(got, want, rtol=rtol, atol=atol, err_msg=name)


if __name__ == "__main__":
    key = jax.random.PRNGKey(0)

    # ---- standalone conv check: tiled/halo path, per-tap (non-fold) contraction,
    #      C_out tiling, fused residual + extra_add
    k1, k2, k3, k4, k5, key = jax.random.split(key, 6)
    xc = jax.random.normal(k1, (2, 128, 640), jnp.float32)
    wc = 0.05 * jax.random.normal(k2, (3, 256, 128), jnp.float32)
    bc = 0.05 * jax.random.normal(k3, (256,), jnp.float32)
    rc = jax.random.normal(k4, (2, 256, 640), jnp.float32)
    ac = jax.random.normal(k5, (2, 256, 640), jnp.float32)
    kw = dict(dilation=2, padding=get_padding(3, 2), pre_lrelu=LRELU_SLOPE,
              residual=rc, extra_add=ac)
    yp = conv1d_pallas(xc, wc, bc, **kw)
    jax.block_until_ready(yp)
    _assert_close("conv_tiled", yp, conv1d_ref(xc, wc, bc, **kw))

    # ---- standalone strided conv check (polyphase path)
    k1, k2, k3, key = jax.random.split(key, 4)
    xs_ = jax.random.normal(k1, (2, 32, 300), jnp.float32)
    ws_ = 0.05 * jax.random.normal(k2, (8, 64, 32), jnp.float32)
    bs_ = 0.05 * jax.random.normal(k3, (64,), jnp.float32)
    kw = dict(stride=2, padding=(8 - 2 + 1) // 2, pre_lrelu=LRELU_SLOPE)
    yp = conv1d_pallas(xs_, ws_, bs_, **kw)
    jax.block_until_ready(yp)
    _assert_close("conv_strided", yp, conv1d_ref(xs_, ws_, bs_, **kw))

    # ---- full Encoder forward at small shapes
    h = {
        "resblock": "1",
        "resblock_kernel_sizes": [3, 5],
        "resblock_dilation_sizes": [[1, 3, 5], [1, 3, 5]],
        "upsample_rates": [2, 2],
        "upsample_kernel_sizes": [4, 4],
        "upsample_initial_channel": 16,
        "num_mels": 4,
    }
    B, L = 2, 32
    upp = int(np.prod(h["upsample_rates"]))

    kp, kx, ke = jax.random.split(key, 3)
    params = init_encoder_params(kp, h)
    x = jax.random.normal(kx, (B, 1, L), jnp.float32)
    eps = jax.random.normal(ke, (B, h["num_mels"], L // upp), jnp.float32)

    z, m, logs = encoder_forward(params, h, x, eps, conv1d_pallas, reparam_pallas)
    jax.block_until_ready(z)

    # correctness check against a pure-JAX (lax.conv) reference with matched quantization
    z_r, m_r, logs_r = encoder_forward(params, h, x, eps, conv1d_ref, reparam_ref)
    _assert_close("m", m, m_r)
    _assert_close("logs", logs, logs_r)
    _assert_close("z", z, z_r)

    print("KERNEL_OK")
</pallas_src>

<mosaic_0001>
module attributes {stable_mosaic.version = 11 : i64} {
  func.func @_conv1d_kernel(%arg0: i32, %arg1: i32, %arg2: i32, %arg3: memref<1x128x512xbf16, #tpu.memory_space<vmem>>, %arg4: memref<1x128x128xbf16, #tpu.memory_space<vmem>>, %arg5: memref<3x128x128xbf16, #tpu.memory_space<vmem>>, %arg6: memref<128x1xf32, #tpu.memory_space<vmem>>, %arg7: memref<1x128x512xbf16, #tpu.memory_space<vmem>>, %arg8: memref<1x128x512xbf16, #tpu.memory_space<vmem>>, %arg9: memref<1x128x512xbf16, #tpu.memory_space<vmem>>) attributes {dimension_semantics = [#tpu.dimension_semantics<parallel>, #tpu.dimension_semantics<parallel>, #tpu.dimension_semantics<parallel>], iteration_bounds = array<i64: 2, 2, 2>, scalar_prefetch = 0 : i64, scratch_operands = 0 : i64, tpu.core_type = #tpu.core_type<tc>, window_params = [{transform_indices = @transform_0, window_bounds = array<i64: 1, 128, 512>}, {transform_indices = @transform_1, window_bounds = array<i64: 1, 128, 128>}, {transform_indices = @transform_2, window_bounds = array<i64: 3, 128, 128>}, {transform_indices = @transform_3, window_bounds = array<i64: 128, 1>}, {transform_indices = @transform_4, window_bounds = array<i64: 1, 128, 512>}, {transform_indices = @transform_5, window_bounds = array<i64: 1, 128, 512>}, {transform_indices = @transform_6, window_bounds = array<i64: 1, 128, 512>}]} {
    %c0 = arith.constant 0 : index
    %c0_0 = arith.constant 0 : index
    %c0_1 = arith.constant 0 : index
    %0 = vector.load %arg3[%c0, %c0_0, %c0_1] : memref<1x128x512xbf16, #tpu.memory_space<vmem>>, vector<1x128x512xbf16>
    %1 = vector.shape_cast %0 : vector<1x128x512xbf16> to vector<128x512xbf16>
    %c0_2 = arith.constant 0 : index
    %c0_3 = arith.constant 0 : index
    %c0_4 = arith.constant 0 : index
    %2 = vector.load %arg4[%c0_2, %c0_3, %c0_4] : memref<1x128x128xbf16, #tpu.memory_space<vmem>>, vector<1x128x128xbf16>
    %3 = vector.shape_cast %2 : vector<1x128x128xbf16> to vector<128x128xbf16>
    %4 = tpu.concatenate %1, %3 in 1 : vector<128x512xbf16>, vector<128x128xbf16> -> vector<128x640xbf16>
    %cst = arith.constant 0.000000e+00 : bf16
    %5 = vector.broadcast %cst : bf16 to vector<128x640xbf16>
    %6 = arith.cmpf oge, %4, %5 : vector<128x640xbf16>
    %cst_5 = arith.constant 1.000980e-01 : bf16
    %7 = vector.broadcast %cst_5 : bf16 to vector<128x640xbf16>
    %8 = arith.mulf %7, %4 : vector<128x640xbf16>
    %9 = arith.select %6, %4, %8 : vector<128x640xi1>, vector<128x640xbf16>
    %c0_6 = arith.constant 0 : index
    %c0_7 = arith.constant 0 : index
    %c0_8 = arith.constant 0 : index
    %10 = vector.load %arg5[%c0_6, %c0_7, %c0_8] : memref<3x128x128xbf16, #tpu.memory_space<vmem>>, vector<1x128x128xbf16>
    %11 = vector.shape_cast %10 : vector<1x128x128xbf16> to vector<128x128xbf16>
    %12 = vector.extract_strided_slice %9 {offsets = [0, 0], sizes = [128, 512], strides = [1, 1]} : vector<128x640xbf16> to vector<128x512xbf16>
    %cst_9 = arith.constant dense<0.000000e+00> : vector<128x512xf32>
    %13 = tpu.matmul %11, %12, %cst_9 {dimension_numbers = #tpu.dot_dimension_numbers<[1], [0], [0], [1], [0, 0, 1, 1], [], []>} : vector<128x128xbf16>, vector<128x512xbf16>, vector<128x512xf32> -> vector<128x512xf32>
    %c1 = arith.constant 1 : index
    %c0_10 = arith.constant 0 : index
    %c0_11 = arith.constant 0 : index
    %14 = vector.load %arg5[%c1, %c0_10, %c0_11] : memref<3x128x128xbf16, #tpu.memory_space<vmem>>, vector<1x128x128xbf16>
    %15 = vector.shape_cast %14 : vector<1x128x128xbf16> to vector<128x128xbf16>
    %16 = vector.extract_strided_slice %9 {offsets = [0, 2], sizes = [128, 512], strides = [1, 1]} : vector<128x640xbf16> to vector<128x512xbf16>
    %cst_12 = arith.constant dense<0.000000e+00> : vector<128x512xf32>
    %17 = tpu.matmul %15, %16, %cst_12 {dimension_numbers = #tpu.dot_dimension_numbers<[1], [0], [0], [1], [0, 0, 1, 1], [], []>} : vector<128x128xbf16>, vector<128x512xbf16>, vector<128x512xf32> -> vector<128x512xf32>
    %18 = arith.addf %13, %17 : vector<128x512xf32>
    %c2 = arith.constant 2 : index
    %c0_13 = arith.constant 0 : index
    %c0_14 = arith.constant 0 : index
    %19 = vector.load %arg5[%c2, %c0_13, %c0_14] : memref<3x128x128xbf16, #tpu.memory_space<vmem>>, vector<1x128x128xbf16>
    %20 = vector.shape_cast %19 : vector<1x128x128xbf16> to vector<128x128xbf16>
    %21 = vector.extract_strided_slice %9 {offsets = [0, 4], sizes = [128, 512], strides = [1, 1]} : vector<128x640xbf16> to vector<128x512xbf16>
    %cst_15 = arith.constant dense<0.000000e+00> : vector<128x512xf32>
    %22 = tpu.matmul %20, %21, %cst_15 {dimension_numbers = #tpu.dot_dimension_numbers<[1], [0], [0], [1], [0, 0, 1, 1], [], []>} : vector<128x128xbf16>, vector<128x512xbf16>, vector<128x512xf32> -> vector<128x512xf32>
    %23 = arith.addf %18, %22 : vector<128x512xf32>
    %c0_16 = arith.constant 0 : index
    %c0_17 = arith.constant 0 : index
    %24 = vector.load %arg6[%c0_16, %c0_17] : memref<128x1xf32, #tpu.memory_space<vmem>>, vector<128x1xf32>
    %25 = vector.broadcast %24 : vector<128x1xf32> to vector<128x512xf32>
    %26 = arith.addf %23, %25 : vector<128x512xf32>
    %c0_18 = arith.constant 0 : index
    %c0_19 = arith.constant 0 : index
    %c0_20 = arith.constant 0 : index
    %27 = vector.load %arg7[%c0_18, %c0_19, %c0_20] : memref<1x128x512xbf16, #tpu.memory_space<vmem>>, vector<1x128x512xbf16>
    %28 = vector.shape_cast %27 : vector<1x128x512xbf16> to vector<128x512xbf16>
    %29 = arith.extf %28 : vector<128x512xbf16> to vector<128x512xf32>
    %30 = arith.addf %26, %29 : vector<128x512xf32>
    %c0_21 = arith.constant 0 : index
    %c0_22 = arith.constant 0 : index
    %c0_23 = arith.constant 0 : index
    %31 = vector.load %arg8[%c0_21, %c0_22, %c0_23] : memref<1x128x512xbf16, #tpu.memory_space<vmem>>, vector<1x128x512xbf16>
    %32 = vector.shape_cast %31 : vector<1x128x512xbf16> to vector<128x512xbf16>
    %33 = arith.extf %32 : vector<128x512xbf16> to vector<128x512xf32>
    %34 = arith.addf %30, %33 : vector<128x512xf32>
    %35 = arith.truncf %34 : vector<128x512xf32> to vector<128x512xbf16>
    %c0_24 = arith.constant 0 : index
    %c0_25 = arith.constant 0 : index
    %c0_26 = arith.constant 0 : index
    %36 = vector.load %arg9[%c0_24, %c0_25, %c0_26] : memref<1x128x512xbf16, #tpu.memory_space<vmem>>, vector<1x128x512xbf16>
    %37 = vector.shape_cast %36 : vector<1x128x512xbf16> to vector<128x512xbf16>
    %38 = vector.shape_cast %35 : vector<128x512xbf16> to vector<1x128x512xbf16>
    tpu.vector_store %arg9[%c0_24, %c0_25, %c0_26], %38 {strides = array<i32>} : memref<1x128x512xbf16, #tpu.memory_space<vmem>>, vector<1x128x512xbf16>,
    return
  }
  func.func @transform_0(%arg0: i32, %arg1: i32, %arg2: i32) -> (i32, i32, i32) {
    %c0_i32 = arith.constant 0 : i32
    %c0_i32_0 = arith.constant 0 : i32
    return %arg0, %c0_i32, %arg1 : i32, i32, i32
  }
  func.func @transform_1(%arg0: i32, %arg1: i32, %arg2: i32) -> (i32, i32, i32) {
    %c1_i32 = arith.constant 1 : i32
    %0 = arith.addi %arg1, %c1_i32 : i32
    %c4_i32 = arith.constant 4 : i32
    %1 = arith.muli %0, %c4_i32 : i32
    %c0_i32 = arith.constant 0 : i32
    %c0_i32_0 = arith.constant 0 : i32
    return %arg0, %c0_i32, %1 : i32, i32, i32
  }
  func.func @transform_2(%arg0: i32, %arg1: i32, %arg2: i32) -> (i32, i32, i32) {
    %c0_i32 = arith.constant 0 : i32
    %c0_i32_0 = arith.constant 0 : i32
    %c0_i32_1 = arith.constant 0 : i32
    return %c0_i32, %arg2, %c0_i32_0 : i32, i32, i32
  }
  func.func @transform_3(%arg0: i32, %arg1: i32, %arg2: i32) -> (i32, i32) {
    %c0_i32 = arith.constant 0 : i32
    %c0_i32_0 = arith.constant 0 : i32
    return %arg2, %c0_i32 : i32, i32
  }
  func.func @transform_4(%arg0: i32, %arg1: i32, %arg2: i32) -> (i32, i32, i32) {
    %c0_i32 = arith.constant 0 : i32
    return %arg0, %arg2, %arg1 : i32, i32, i32
  }
  func.func @transform_5(%arg0: i32, %arg1: i32, %arg2: i32) -> (i32, i32, i32) {
    %c0_i32 = arith.constant 0 : i32
    return %arg0, %arg2, %arg1 : i32, i32, i32
  }
  func.func @transform_6(%arg0: i32, %arg1: i32, %arg2: i32) -> (i32, i32, i32) {
    %c0_i32 = arith.constant 0 : i32
    return %arg0, %arg2, %arg1 : i32, i32, i32
  }
}

</mosaic_0001>

<bundles_post_ra>
// kernel: tpu_custom_call.1
= control target key start
LH: loop header
LB: loop body
LE: loop exit
PB: predicated region body
PF: predicated region fallthrough
CT: control target
= control target key end

     0   :  { %s5947_s0 = inlined_call_operand.hbm [shape: bf16[2,128,1152], index: 0, kind: input, shape index: {}]   ;;  %s5948_s1 = inlined_call_operand.hbm [shape: bf16[2,128,1152], index: 1, kind: input, shape index: {}]   ;;  %s5949_s2 = inlined_call_operand.hbm [shape: bf16[3,256,128], index: 2, kind: input, shape index: {}]   ;;  %s5950_s3 = inlined_call_operand.vmem [shape: f32[256,1], index: 3, kind: input, shape index: {}]   ;;  %s5951_s4 = inlined_call_operand.hbm [shape: bf16[2,256,640], index: 4, kind: input, shape index: {}]   ;;  %s5952_s5 = inlined_call_operand.hbm [shape: bf16[2,256,640], index: 5, kind: input, shape index: {}]   ;;  %s5953_s6 = inlined_call_operand.hbm [shape: bf16[2,256,640], index: 6, kind: output, shape index: {}]  }
   0x1   :  { %5998 = sst [smem:[#allocation50_spill]] %s5947_s0 }
   0x2   :  { %5999 = sst [smem:[#allocation51_spill]] %s5950_s3 }
   0x3   :  { %6000 = sst [smem:[#allocation52_spill]] %s5951_s4 }
   0x4   :  { %6001 = sst [smem:[#allocation53_spill]] %s5952_s5 }
   0x5   :  { %6002 = sst [smem:[#allocation54_spill]] %s5953_s6 }
   0x6   :  { %11 = vsyncpa [#allocation3], 0 }
   0x7   :  { %13 = vsyncpa [#allocation3 + $0x1], 0 }
   0x8   :  { %14 = vsyncpa [#allocation6], 0 }
   0x9   :  { %16 = vsyncpa [#allocation6 + $0x1], 0 }
   0xa   :  { %17 = vsyncpa [#allocation9], 0 }
   0xb   :  { %19 = vsyncpa [#allocation9 + $0x1], 0 }
   0xc   :  { %20 = vsyncpa [#allocation4], 0 }
   0xd   :  { %22 = vsyncpa [#allocation4 + $0x1], 0  ;;  %s4177_s21 = smov 0   ;;  %s4179_s22 = smov 0  }
   0xe   :  { %s4181_s23 = smov 0   ;;  %s4183_s24 = smov 0  }
   0xf   :  { %s4185_s25 = smov 0   ;;  %s4187_s26 = smov 0  }
  0x10   :  { %s4189_s27 = smov 0   ;;  %s4191_s28 = smov 0  }
  0x11   :  { %s4193_s29 = smov 0   ;;  %s4195_s30 = smov 0  }
  0x12   :  { %s4197_s7 = smov 0   ;;  %s4199_s8 = smov 0  }
  0x13   :  { %s4201_s9 = smov 0   ;;  %s4203_s10 = smov 0  }
  0x14   :  { %s4205_s11 = smov 0   ;;  %s4207_s12 = smov 0  }
  0x15   :  { %s4209_s13 = smov 0   ;;  %s4211_s14 = smov 0  }
  0x16   :  { %s4213_s15 = smov 0  }
  0x17 LB: > { %6003 = sst [smem:[#allocation20_spill]] %s4042_s21  ;;  %s4273_s16 = sadd.s32 4294967295, %s4114_s15   ;;  %s4114_s15 = sphi %s4213_s15, %s28_s15   ;;  %s4110_s14 = sphi %s4211_s14, %s6204_s14   ;;  %s4106_s13 = sphi %s4209_s13, %s6190_s13   ;;  %s4102_s12 = sphi %s4207_s12, %s6203_s12   ;;  %s4098_s11 = sphi %s4205_s11, %s6202_s11   ;;  %s4094_s10 = sphi %s4203_s10, %s6188_s10   ;;  %s4090_s9 = sphi %s4201_s9, %s6201_s9   ;;  %s4086_s8 = sphi %s4199_s8, %s6187_s8   ;;  %s4082_s7 = sphi %s4197_s7, %s6186_s7   ;;  %s4078_s30 = sphi %s4195_s30, %s6185_s30   ;;  %s4074_s29 = sphi %s4193_s29, %s6200_s29   ;;  %s4070_s28 = sphi %s4191_s28, %s6199_s28   ;;  %s4066_s27 = sphi %s4189_s27, %s6198_s27   ;;  %s4062_s26 = sphi %s4187_s26, %s6197_s26   ;;  %s4058_s25 = sphi %s4185_s25, %s6196_s25   ;;  %s4054_s24 = sphi %s4183_s24, %s6194_s24   ;;  %s4050_s23 = sphi %s4181_s23, %s6193_s23   ;;  %s4046_s22 = sphi %s4179_s22, %s6191_s22   ;;  %s4042_s21 = sphi %s4177_s21, %s6181_s21  }
  0x18   : > { %6004 = sst [smem:[#allocation21_spill]] %s4046_s22  ;;  %s40_s18 = sadd.s32 1, %s4102_s12 }
  0x19   : > { %6005 = sst [smem:[#allocation22_spill]] %s4082_s7  ;;  %s43_s19 = sadd.s32 1, %s4106_s13 }
  0x1a   : > { %6006 = sst [smem:[#allocation23_spill]] %s4086_s8  ;;  %p41_p0 = scmp.ge.s32.totalorder %s40_s18, 2 }
  0x1b   : > { %6007 = sst [smem:[#allocation24_spill]] %s4090_s9  ;;  %s47_s20 = sadd.s32 1, %s4110_s14 }
  0x1c   : > { %6008 = sst [smem:[#allocation25_spill]] %s4094_s10  ;;  %p63_p1 = scmp.ne.s32.totalorder %s4086_s8, %s4082_s7 }
  0x1d   : > { %6009 = sst [smem:[#allocation26_spill]] %s4098_s11  ;;  %s6206_s18 = smov (%p41_p0, %s40_s18), 0 }
  0x1e   : > { %6010 = sst [smem:[#allocation27_spill]] %s4106_s13  ;;  %s6208_s19 = smov (!%p41_p0, %s43_s19), %s4106_s13 }
  0x1f   : > { %6011 = sst [smem:[#allocation28_spill]] %s6206_s18  ;;  %p64_p2 = scmp.eq.s32.totalorder %s4114_s15, 0 }
  0x20   : > { %p69_p3 = scmp.ne.s32.totalorder %s4082_s7, %s4078_s30  ;;  %p45_p4 = scmp.ge.s32.totalorder %s6208_s19, 2 }
  0x21   : > { %p70_p5 = scmp.eq.s32.totalorder %s4273_s16, 0  ;;  %p4291_p6 = por %p64_p2, %p63_p1 }
  0x22   : > { %s4296_s11 = sshll.u32 %s4106_s13, 2  ;;  %s6210_s19 = smov (%p45_p4, %s6208_s19), 0 }
  0x23   : > { %6013 = sst [smem:[#allocation29_spill]] %s6210_s19  ;;  %s6212_s20 = smov (!%p45_p4, %s47_s20), %s4110_s14 }
  0x24   : > { %s4303_s6 = ssub.s32 %s4106_s13, %s6210_s19  ;;  %p4307_p7 = por %p70_p5, %p69_p3 }
  0x25   : > { %p49_p8 = scmp.ge.s32.totalorder %s6212_s20, 2  ;;  %s3346_s10 = sadd.s32 4, %s4296_s11 }
  0x26   : > { %s6014_s30 = scalar_select %p4307_p7, 1, 0 }
  0x27   : > { %s3347_s3 = sshll.u32 %s6210_s19, 2  ;;  %s88_s9 = sadd.s32 1, %s4074_s29 }
  0x28   : > { %6015 = sst [smem:[#allocation30_spill]] %s6014_s30  ;;  %s6214_s20 = smov (%p49_p8, %s6212_s20), 0 }
  0x29   : > { %6016 = sst [smem:[#allocation31_spill]] %s6214_s20  ;;  %s3348_s13 = sadd.s32 4, %s3347_s3 }
  0x2a   : > { %p95_p9 = scmp.ne.s32.totalorder %s4074_s29, %s4070_s28  ;;  %s51_s30 = ssub.s32 %s4110_s14, %s6214_s20 }
  0x2b   : > { %s84_s7 = ssub.s32 %s3346_s10, %s3348_s13  ;;  %s53_s5 = sor.u32 %s4303_s6, %s51_s30 }
  0x2c   : > { %s85_s19 = sor.u32 %s84_s7, %s51_s30  ;;  %p54_p10 = scmp.eq.s32.totalorder %s53_s5, 0 }
  0x2d   : > { %p86_p11 = scmp.eq.s32.totalorder %s85_s19, 0  ;;  %p4323_p12 = por %p95_p9, %p64_p2 }
  0x2e   : > { %p101_p13 = scmp.ne.s32.totalorder %s4070_s28, %s4066_s27  ;;  %s6018_s3 = sadd.s32 1, %s4086_s8 }
  0x2f   : > { %s4332_s20 = scalar_select %p54_p10, %s4086_s8, %s6018_s3  }
  0x30   : > { %s4335_s10 = scalar_select %p86_p11, %s4074_s29, %s88_s9  }
  0x31   : > { %6019 = sst [smem:[#allocation32_spill]] %s4332_s20  ;;  %p4339_p0 = por %p101_p13, %p70_p5 }
  0x32   : > { %6020 = sst [smem:[#allocation33_spill]] %s4335_s10  ;;  %s111_s7 = ssub.s32 %s4102_s12, %s6206_s18 }
  0x33   : > { %s6021_s5 = scalar_select %p4339_p0, 1, 0 }
  0x34   : > { %p112_p1 = scmp.eq.s32.totalorder %s111_s7, 0  ;;  %s114_s13 = sadd.s32 1, %s4062_s26 }
  0x35   : > { %p121_p3 = scmp.ne.s32.totalorder %s4062_s26, %s4058_s25  ;;  %p127_p4 = scmp.ne.s32.totalorder %s4058_s25, %s4054_s24 }
  0x36   : > { %s4351_s27 = scalar_select %p112_p1, %s4062_s26, %s114_s13  }
  0x37   : > { %p4355_p8 = por %p121_p3, %p64_p2  ;;  %p4361_p9 = por %p127_p4, %p70_p5 }
  0x38   : > { %6022 = sst [smem:[#allocation34_spill]] %s4351_s27  ;;  %s165_s3 = sor.u32 %s111_s7, %s51_s30 }
  0x39   : > { %s6024_s19 = scalar_select %p4361_p9, 1, 0 }
  0x3a   : > { %s170_s18 = sadd.s32 1, %s4050_s23  ;;  %s167_s20 = sor.u32 %s165_s3, %s4303_s6 }
  0x3b   : > { %6025 = sst [smem:[#allocation35_spill]] %s6024_s19  ;;  %p177_p10 = scmp.ne.s32.totalorder %s4050_s23, %s4046_s22 }
  0x3c   : > { %p168_p11 = scmp.eq.s32.totalorder %s167_s20, 0  ;;  %p183_p13 = scmp.ne.s32.totalorder %s4046_s22, %s4042_s21 }
  0x3d   : > { %p4373_p0 = por %p177_p10, %p64_p2  ;;  %p241_p1 = scmp.eq.s32.totalorder %s4273_s16, 7 }
  0x3e   : > { %s4379_s13 = scalar_select %p168_p11, %s4050_s23, %s170_s18  }
  0x3f   : > { %s6026_s24 = scalar_select %p4373_p0, 1, 0 }
  0x40   : > { %6027 = sst [smem:[#allocation36_spill]] %s4379_s13  ;;  %p4383_p3 = por %p183_p13, %p70_p5 }
  0x41   : > { %p4387_p4 = por %p241_p1, %p177_p10  ;;  %s6032_s6 = sadd.s32 4294967294, %s4114_s15  }
  0x42   : > { %s6028_s10 = scalar_select %p4383_p3, 1, 0 }
  0x43   : > { %s6030_s30 = scalar_select %p4387_p4, 1, 0 }
  0x44   : > { %6029 = sst [smem:[#allocation37_spill]] %s6028_s10  ;;  %p247_p9 = scmp.eq.s32.totalorder %s6032_s6, 7 }
  0x45   : > { %6031 = sst [smem:[#allocation38_spill]] %s6030_s30  ;;  %p3161_p2 = scmp.ge.s32.totalorder %s4114_s15, 8 }
  0x46   : > { %p4393_p7 = por %p247_p9, %p183_p13 }
  0x47   : > { %263 = sbr.rel (%p3161_p2) target bundleno = 240 (0xf0), region = 16 }
  0x48   : > { %s6033_s20 = scalar_select %p4393_p7, 1, 0 }
  0x4a   : > { %6034 = sst [smem:[#allocation39_spill]] %s6033_s20 }
  0x4e   : > { %266 = sbr.rel (!%p4291_p6) target bundleno = 111 (0x6f), region = 20  ;;  %s267_s18 = sand.u32 (%p4291_p6), 1, %s4086_s8  }
  0x4f   : > { %s3162_s7 = sshll.u32 (%p4291_p6), %s267_s18, 8  ;;  %s4401_s3 = scalar_lea.sflag (%p4291_p6), [#allocation3], %s267_s18 }
  0x50   : > { %s271_s27 = scalar_lea.vmem (%p4291_p6), [#allocation2], %s3162_s7  ;;  %s3518_s13 = smul.u32 (%p4291_p6), 144, %s4110_s14 }
  0x51   : > { %s287_s6 = sshll.u32 (%p4291_p6), %s271_s27, 4  ;;  %s6035_s0 = sld [smem:[#allocation50_spill]] (%p4291_p6)  ;;  %s4405_s6 = int_to_ptr.vmem [resolvable:$true] %s287_s6 }
  0x52   : > { %s282_s21 = sadd.s32 (%p4291_p6), %s3518_s13, %s4296_s11 }
  0x53   : > { %s3166_s20 = sshll.u32 (%p4291_p6), %s282_s21, 6 }
  0x57   : > { %s4410_s22 = scalar_lea.hbm %s6035_s0, %s3166_s20  ;;  %s3805_s7 = scalar_lea.hbm %s6035_s0, 18432 }
  0x58   : > { %s3801_s17 = scalar_lea.hbm %s4410_s22, 4096  ;;  %p3806_p6 = scmp.lt.u32.totalorder %s4410_s22, %s6035_s0 }
  0x59   : > { %p3802_p5 = scmp.ne.s32.totalorder %s4410_s22, %s3801_s17  ;;  %p3807_p9 = scmp.lt.u32.totalorder %s3805_s7, %s3801_s17 }
  0x5a   : > { %p3809_p11 = scmp.lt.u32.totalorder %s3801_s17, %s4410_s22 }
  0x5b   : > { %p3808_p10 = por %p3807_p9, %p3806_p6 }
  0x5d   : > { %p3810_p13 = por %p3809_p11, %p3808_p10 }
  0x5f   : > { %p3811_p1 = pnand %p3810_p13, %p3802_p5 }
  0x61   : > { %3814 = shalt.err (!%p3811_p1)
}
  0x62   : > { %s3815_s21 = scalar_lea.vmem %s4405_s6, 4096  ;;  %s4116_s10 = smov [#allocation2]  }
  0x63   : > { %p3816_p2 = scmp.ne.s32.totalorder %s4405_s6, %s3815_s21  ;;  %s3819_s30 = sshll.u32 %s4116_s10, 4  ;;  %s3820_s30 = int_to_ptr.vmem [resolvable:$false] %s3819_s30 }
  0x64   : > { %s3821_s8 = scalar_lea.vmem %s3820_s30, 8192  ;;  %p3822_p7 = scmp.lt.s32.totalorder %s4405_s6, %s3820_s30 }
  0x65   : > { %p3823_p4 = scmp.lt.s32.totalorder %s3821_s8, %s3815_s21 }
  0x67   : > { %p3824_p3 = por %p3823_p4, %p3822_p7 }
  0x69   : > { %p3825_p0 = pnand %p3824_p3, %p3816_p2 }
  0x6b   : > { %3828 = shalt.err (!%p3825_p0)
}
  0x6c   : > { %s4117_s20 = smov 576   ;;  %s4118_s17 = smov 256  }
  0x6d   : > { %s4119_s18 = smov 16  }
  0x6e   : > { %293 = dma.hbm_to_vmem [thread:$0]  %s4410_s22, 4096, %s4405_s6, %s4401_s3, %s4117_s20, %s4118_s17, %s4119_s18  }
  0x6f PF: > { %s4429_s7 = sand.u32 1, %s4114_s15   ;;  %s299_s27 = sand.u32 1, %s4074_s29  }
  0x70   : > { %s3170_s13 = sshll.u32 %s299_s27, 6  ;;  %s2991_s21 = smul.u32 144, %s4110_s14 }
  0x71   : > { %s301_s10 = scalar_lea.vmem [#allocation5], %s3170_s13  ;;  %s298_s20 = scalar_lea.sflag [#allocation6], %s4429_s7 }
  0x72   : > { %s311_s30 = sshll.u32 %s301_s10, 4  ;;  %s2992_s8 = sadd.s32 %s4296_s11, %s2991_s21  ;;  %s4434_s30 = int_to_ptr.vmem [resolvable:$true] %s311_s30 }
  0x73   : > { %s3172_s0 = sshll.u32 %s2992_s8, 6  ;;  %s3833_s13 = scalar_lea.hbm %s5948_s1, 18432 }
  0x74   : > { %s2994_s3 = scalar_lea.hbm %s5948_s1, %s3172_s0 }
  0x75   : > { %s4439_s6 = scalar_lea.hbm %s2994_s3, 256  ;;  %s3857_s17 = scalar_lea.hbm %s2994_s3, 1280 }
  0x76   : > { %p3830_p7 = scmp.ne.s32.totalorder %s4439_s6, %s3857_s17  ;;  %p3834_p4 = scmp.lt.u32.totalorder %s4439_s6, %s5948_s1 }
  0x77   : > { %p3835_p5 = scmp.lt.u32.totalorder %s3833_s13, %s3857_s17  ;;  %p3837_p9 = scmp.lt.u32.totalorder %s3857_s17, %s4439_s6 }
  0x78   : > { %p3831_p0 = pnand %p3830_p7, %p4323_p12 }
  0x79   : > { %p3836_p6 = por %p3835_p5, %p3834_p4 }
  0x7a   : > { %p3832_p3 = pneg %p3831_p0 }
  0x7b   : > { %p3838_p10 = por %p3837_p9, %p3836_p6 }
  0x7d   : > { %p3839_p11 = pnand %p3838_p10, %p3832_p3 }
  0x7f   : > { %3842 = shalt.err (!%p3839_p11)
}
  0x80   : > { %s3843_s0 = scalar_lea.vmem %s4434_s30, 1024  ;;  %s4120_s19 = smov [#allocation5]  }
  0x81   : > { %p3844_p13 = scmp.ne.s32.totalorder %s4434_s30, %s3843_s0  ;;  %s3847_s8 = sshll.u32 %s4120_s19, 4  ;;  %s3848_s8 = int_to_ptr.vmem [resolvable:$false] %s3847_s8 }
  0x82   : > { %s3849_s22 = scalar_lea.vmem %s3848_s8, 2048  ;;  %p3850_p7 = scmp.lt.s32.totalorder %s4434_s30, %s3848_s8 }
  0x83   : > { %p3845_p1 = pnand %p3844_p13, %p4323_p12  ;;  %p3851_p0 = scmp.lt.s32.totalorder %s3849_s22, %s3843_s0 }
  0x85   : > { %p3846_p2 = pneg %p3845_p1  ;;  %p3852_p4 = por %p3851_p0, %p3850_p7 }
  0x87   : > { %p3853_p5 = pnand %p3852_p4, %p3846_p2 }
  0x89   : > { %3856 = shalt.err (!%p3853_p5)
}
  0x8a   : > { %s4121_s3 = smov 576   ;;  %s4122_s17 = smov 64  }
  0x8b   : > { %s4123_s18 = smov 4  }
  0x8c   : > { %3527 = dma.hbm_to_vmem [thread:$0]  (%p4323_p12), %s4439_s6, 1024, %s4434_s30, %s298_s20, %s4121_s3, %s4122_s17, %s4123_s18  }
  0x8d   : > { %s323_s27 = sand.u32 1, %s4062_s26   ;;  %s3351_s13 = sshll.u32 %s4102_s12, 10 }
  0x8e   : > { %s3519_s21 = smul.u32 192, %s323_s27  ;;  %s331_s19 = scalar_lea.hbm %s5949_s2, %s3351_s13 }
  0x8f   : > { %s3528_s8 = scalar_select %p4355_p8, [#allocation0], [#allocation14] }
  0x90   : > { %s325_s30 = scalar_lea.vmem [#allocation7], %s3519_s21  ;;  %s4124_s22 = smov 2048  }
  0x91   : > { %s336_s4 = sld [smem:[%s3528_s8]]   ;;  %s344_s6 = sshll.u32 %s325_s30, 4  ;;  %s345_s6 = int_to_ptr.vmem [resolvable:$true] %s344_s6 }
  0x92   : > { %3529 = sst [smem:[#allocation13]] (%p4355_p8), %s4124_s22  ;;  %s4125_s3 = smov 1024  }
  0x93   : > { %3530 = sst [smem:[#allocation13 + $0x1]] (%p4355_p8), %s4125_s3  ;;  %s4126_s17 = smov 16  }
  0x94   : > { %3531 = sst [smem:[#allocation13 + $0x2]] (%p4355_p8), %s4126_s17  ;;  %s4127_s18 = smov 64  }
  0x95   : > { %3532 = sst [smem:[#allocation13 + $0x3]] (%p4355_p8), %s4127_s18  ;;  %s4128_s21 = smov 4  }
  0x96   : > { %3533 = sst [smem:[#allocation13 + $0x4]] (%p4355_p8), %s4127_s18  ;;  %s4129_s10 = smov [#allocation12]  }
  0x97   : > { %s3175_s27 = sshll.u32 %s336_s4, 26  ;;  %3534 = sst [smem:[#allocation13 + $0x5]] (%p4355_p8), %s4128_s21 }
  0x98   : > { %s3176_s13 = sadd.s32 134217728, %s3175_s27  ;;  %p6036_p12 = scmp.ne.s32.totalorder %s6026_s24, 0 }
  0x99   : > { %3535 = dma.general (%p4355_p8), %s331_s19, 3072, %s345_s6, %s298_s20, %s4129_s10, [#allocation13], %s3176_s13, 0  }
  0x9a   : > { %375 = sbr.rel (!%p6036_p12) target bundleno = 196 (0xc4), region = 36  ;;  %s378_s0 = sand.u32 (%p6036_p12), 1, %s4050_s23  }
  0x9b   : > { %s3177_s8 = sshll.u32 (%p6036_p12), %s378_s0, 8  ;;  %s383_s4 = ssub.s32 (%p6036_p12), 5, %s4296_s11 }
  0x9c   : > { %p384_p3 = scmp.lt.s32.totalorder (%p6036_p12), %s383_s4, 4  ;;  %s377_s22 = scalar_lea.sflag (%p6036_p12), [#allocation9], %s4429_s7 }
  0x9d   : > { %s380_s20 = scalar_lea.vmem (%p6036_p12), [#allocation8], %s3177_s8 }
  0xa1   : > { %s6216_s4 = smov (!%p384_p3, %s383_s4), 4 }
  0xa2   : > { %s4494_s30 = sshll.u32 %s6216_s4, 10 }
  0xa3   : > { %s388_s9 = ssub.s32 4096, %s4494_s30 }
  0xa4   : > { %389 = vsyncadd %s377_s22, %s388_s9  ;;  %p3181_p8 = scmp.ne.s32.totalorder %s4494_s30, 0  ;;  %s3520_s19 = smul.u32 80, %s4102_s12 }
  0xa5   : > { %s3521_s6 = smul.u32 160, %s4110_s14  ;;  %s3184_s3 = sshll.u32 %s6216_s4, 2 }
  0xa6   : > { %s392_s17 = sadd.s32 %s3520_s19, %s4296_s11  ;;  %s399_s18 = sshll.u32 %s380_s20, 4  ;;  %s4505_s18 = int_to_ptr.vmem [resolvable:$true] %s399_s18 }
  0xa7   : > { %s394_s27 = sadd.s32 %s3521_s6, %s392_s17  ;;  %s6037_s0 = sld [smem:[#allocation52_spill]] }
  0xa8   : > { %s3183_s13 = sshll.u32 %s394_s27, 6 }
  0xad   : > { %s4510_s8 = scalar_lea.hbm %s6037_s0, %s3183_s13  ;;  %s3862_s6 = scalar_lea.hbm %s6037_s0, 20480 }
  0xae   : > { %s3858_s9 = scalar_lea.hbm %s4510_s8, %s4494_s30  ;;  %p3863_p11 = scmp.lt.u32.totalorder %s4510_s8, %s6037_s0 }
  0xaf   : > { %p3859_p6 = scmp.ne.s32.totalorder %s4510_s8, %s3858_s9  ;;  %p3864_p13 = scmp.lt.u32.totalorder %s3862_s6, %s3858_s9 }
  0xb0   : > { %p3866_p2 = scmp.lt.u32.totalorder %s3858_s9, %s4510_s8 }
  0xb1   : > { %p3860_p9 = pnand %p3859_p6, %p3181_p8  ;;  %p3865_p1 = por %p3864_p13, %p3863_p11 }
  0xb3   : > { %p3861_p10 = pneg %p3860_p9  ;;  %p3867_p7 = por %p3866_p2, %p3865_p1 }
  0xb5   : > { %p3868_p0 = pnand %p3867_p7, %p3861_p10 }
  0xb7   : > { %3871 = shalt.err (!%p3868_p0)
}
  0xb8   : > { %s3872_s13 = scalar_lea.vmem %s4505_s18, %s4494_s30  ;;  %s4130_s21 = smov [#allocation8]  }
  0xb9   : > { %p3873_p4 = scmp.ne.s32.totalorder %s4505_s18, %s3872_s13  ;;  %s3876_s10 = sshll.u32 %s4130_s21, 4  ;;  %s3877_s10 = int_to_ptr.vmem [resolvable:$false] %s3876_s10 }
  0xba   : > { %s3878_s19 = scalar_lea.vmem %s3877_s10, 8192  ;;  %p3879_p3 = scmp.lt.s32.totalorder %s4505_s18, %s3877_s10 }
  0xbb   : > { %p3874_p5 = pnand %p3873_p4, %p3181_p8  ;;  %p3880_p6 = scmp.lt.s32.totalorder %s3878_s19, %s3872_s13 }
  0xbd   : > { %p3875_p12 = pneg %p3874_p5  ;;  %p3881_p9 = por %p3880_p6, %p3879_p3 }
  0xbf   : > { %p3882_p11 = pnand %p3881_p9, %p3875_p12 }
  0xc1   : > { %3885 = shalt.err (!%p3882_p11)
}
  0xc2   : > { %s4131_s9 = smov 320   ;;  %s4132_s20 = smov 256  }
  0xc3   : > { %405 = dma.hbm_to_vmem [thread:$0]  (%p3181_p8), %s4510_s8, %s4494_s30, %s4505_s18, %s377_s22, %s4131_s9, %s4132_s20, %s3184_s3  }
  0xc4 PF: > { %p6038_p10 = scmp.ne.s32.totalorder %s6026_s24, 0 }
  0xc5   : > { %s411_s6 = sand.u32 (%p6038_p10), 1, %s4050_s23   ;;  %s416_s27 = ssub.s32 (%p6038_p10), 5, %s4296_s11 }
  0xc6   : > { %408 = sbr.rel (!%p6038_p10) target bundleno = 240 (0xf0), region = 40  ;;  %s3187_s17 = sshll.u32 (%p6038_p10), %s411_s6, 8 }
  0xc7   : > { %p417_p13 = scmp.lt.s32.totalorder (%p6038_p10), %s416_s27, 4  ;;  %s410_s30 = scalar_lea.sflag (%p6038_p10), [#allocation9], %s4429_s7 }
  0xc8   : > { %s413_s22 = scalar_lea.vmem (%p6038_p10), [#allocation10], %s3187_s17 }
  0xcd   : > { %s6218_s27 = smov (!%p417_p13, %s416_s27), 4 }
  0xce   : > { %s4547_s13 = sshll.u32 %s6218_s27, 10 }
  0xcf   : > { %s421_s4 = ssub.s32 4096, %s4547_s13 }
  0xd0   : > { %422 = vsyncadd %s410_s30, %s421_s4  ;;  %p3191_p8 = scmp.ne.s32.totalorder %s4547_s13, 0  ;;  %s3522_s24 = smul.u32 80, %s4102_s12 }
  0xd1   : > { %s3523_s3 = smul.u32 160, %s4110_s14  ;;  %s3194_s18 = sshll.u32 %s6218_s27, 2 }
  0xd2   : > { %s425_s8 = sadd.s32 %s3522_s24, %s4296_s11  ;;  %s432_s21 = sshll.u32 %s413_s22, 4  ;;  %s4558_s21 = int_to_ptr.vmem [resolvable:$true] %s432_s21 }
  0xd3   : > { %s427_s10 = sadd.s32 %s3523_s3, %s425_s8  ;;  %s6039_s6 = sld [smem:[#allocation53_spill]] }
  0xd4   : > { %s3193_s19 = sshll.u32 %s427_s10, 6 }
  0xd9   : > { %s4563_s17 = scalar_lea.hbm %s6039_s6, %s3193_s19  ;;  %s3890_s24 = scalar_lea.hbm %s6039_s6, 20480 }
  0xda   : > { %s3886_s4 = scalar_lea.hbm %s4563_s17, %s4547_s13  ;;  %p3891_p0 = scmp.lt.u32.totalorder %s4563_s17, %s6039_s6 }
  0xdb   : > { %p3887_p1 = scmp.ne.s32.totalorder %s4563_s17, %s3886_s4  ;;  %p3892_p4 = scmp.lt.u32.totalorder %s3890_s24, %s3886_s4 }
  0xdc   : > { %p3894_p12 = scmp.lt.u32.totalorder %s3886_s4, %s4563_s17 }
  0xdd   : > { %p3888_p2 = pnand %p3887_p1, %p3191_p8  ;;  %p3893_p5 = por %p3892_p4, %p3891_p0 }
  0xdf   : > { %p3889_p7 = pneg %p3888_p2  ;;  %p3895_p3 = por %p3894_p12, %p3893_p5 }
  0xe1   : > { %p3896_p6 = pnand %p3895_p3, %p3889_p7 }
  0xe3   : > { %3899 = shalt.err (!%p3896_p6)
}
  0xe4   : > { %s3900_s10 = scalar_lea.vmem %s4558_s21, %s4547_s13  ;;  %s4133_s19 = smov [#allocation10]  }
  0xe5   : > { %p3901_p9 = scmp.ne.s32.totalorder %s4558_s21, %s3900_s10  ;;  %s3904_s9 = sshll.u32 %s4133_s19, 4  ;;  %s3905_s9 = int_to_ptr.vmem [resolvable:$false] %s3904_s9 }
  0xe6   : > { %s3906_s20 = scalar_lea.vmem %s3905_s9, 8192  ;;  %p3907_p13 = scmp.lt.s32.totalorder %s4558_s21, %s3905_s9 }
  0xe7   : > { %p3902_p11 = pnand %p3901_p9, %p3191_p8  ;;  %p3908_p1 = scmp.lt.s32.totalorder %s3906_s20, %s3900_s10 }
  0xe9   : > { %p3903_p10 = pneg %p3902_p11  ;;  %p3909_p2 = por %p3908_p1, %p3907_p13 }
  0xeb   : > { %p3910_p0 = pnand %p3909_p2, %p3903_p10 }
  0xed   : > { %3913 = shalt.err (!%p3910_p0)
}
  0xee   : > { %s4134_s4 = smov 320   ;;  %s4135_s11 = smov 256  }
  0xef   : > { %438 = dma.hbm_to_vmem [thread:$0]  (%p3191_p8), %s4563_s17, %s4547_s13, %s4558_s21, %s410_s30, %s4134_s4, %s4135_s11, %s3194_s18  }
  0xf0 PF: > { %p3197_p7 = scmp.ge.s32.totalorder %s4114_s15, 1  ;;  %p440_p4 = scmp.lt.s32.totalorder %s4114_s15, 9 }
  0xf2   : > { %p441_p5 = pnand %p3197_p7, %p440_p4 }
  0xf4   : > { %444 = sbr.rel (%p441_p5) target bundleno = 953 (0x3b9), region = 44 }
  0xfb   : > { %s6040_s22 = sld [smem:[#allocation22_spill]]  ;;  %s6041_s24 = sld [smem:[#allocation30_spill]] }
 0x101   : > { %s446_s3 = sand.u32 1, %s6040_s22   ;;  %p6042_p12 = scmp.ne.s32.totalorder %s6041_s24, 0 }
 0x102   : > { %s3198_s8 = sshll.u32 %s446_s3, 8  ;;  %s447_s10 = scalar_lea.sflag [#allocation3], %s446_s3 }
 0x103   : > { %s4596_s19 = scalar_lea.vmem [#allocation2], %s3198_s8 }
 0x104   : > { %4019 = dma.done.wait (%p6042_p12), %s447_s10, 4096  }
 0x105   : > { %4021 = vsyncadd (%p6042_p12), %s447_s10, 4294963200  ;;  %s455_s7 = sand.u32 1, %s4273_s16   ;;  %s457_s27 = sand.u32 1, %s4070_s28  }
 0x106   : > { %s3199_s13 = sshll.u32 %s457_s27, 6  ;;  %s456_s30 = scalar_lea.sflag [#allocation6], %s455_s7 }
 0x107   : > { %s4604_s18 = scalar_lea.vmem [#allocation5], %s3199_s13  ;;  %p6043_p8 = scmp.ne.s32.totalorder %s6021_s5, 0 }
 0x109   : > { %4023 = dma.done.wait (%p6043_p8), %s456_s30, 1024  }
 0x10a   : > { %4025 = vsyncadd (%p6043_p8), %s456_s30, 4294966272  ;;  %s6044_s21 = sld [smem:[#allocation35_spill]]  ;;  %s466_s17 = sand.u32 1, %s4058_s25  }
 0x10b   : > { %s3524_s9 = smul.u32 192, %s466_s17 }
 0x10d   : > { %s4611_s20 = scalar_lea.vmem [#allocation7], %s3524_s9 }
 0x110   : > { %p6045_p3 = scmp.ne.s32.totalorder %s6044_s21, 0 }
 0x112   : > { %4027 = dma.done.wait (%p6045_p3), %s456_s30, 3072  }
 0x113   : > { %4029 = vsyncadd (%p6045_p3), %s456_s30, 4294964224  ;;  %s6046_s16 = sld [smem:[#allocation21_spill]]  ;;  %s6047_s4 = sld [smem:[#allocation37_spill]] }
 0x114   : > { %s474_s5 = scalar_lea.sflag [#allocation9], %s455_s7 }
 0x119   : > { %s475_s11 = sand.u32 1, %s6046_s16   ;;  %p6048_p6 = scmp.ne.s32.totalorder %s6047_s4, 0 }
 0x11a   : > { %s4620_s22 = sshll.u32 %s475_s11, 8 }
 0x11b   : > { %s4623_s24 = scalar_lea.vmem [#allocation8], %s4620_s22 }
 0x11c   : > { %4031 = dma.done.wait (%p6048_p6), %s474_s5, 8192  }
 0x11d   : > { %4033 = vsyncadd (%p6048_p6), %s474_s5, 4294959104  ;;  %v3721_v0 = vld [vmem:[%s4596_s19 + $0xc] ss:$16 sps:$4 sm:$0xff]   ;;  %v3723_v1 = vld [vmem:[%s4596_s19 + $0x4] ss:$16 sps:$4 sm:$0xff]   ;;  %s4136_s3 = smov 126  }
 0x11e   : > { %vm833_vm0 = vcmp.ge.bf16.partialorder %v3721_v0, 0  ;;  %v873_v2 = vmul.bf16 1036860877, %v3721_v0  ;;  %v3725_v3 = vld [vmem:[%s4604_s18] sm:$0xff]   ;;  %vm831_vm1 = vcmp.ge.bf16.partialorder %v3723_v1, 0  ;;  %v3734_v23 = vld [vmem:[%s4604_s18 + $0x8] sm:$0xff]  }
 0x11f   : > { %v871_v4 = vmul.bf16 1036860877, %v3723_v1  ;;  %vm834_vm2 = vcmp.ge.bf16.partialorder %v3725_v3, 0  ;;  %v874_v6 = vmul.bf16 1036860877, %v3725_v3  ;;  %vm839_vm9 = vcmp.ge.bf16.partialorder %v3734_v23, 0 }
 0x120   : > { %v4632_v5 = vsel %vm833_vm0, %v3721_v0, %v873_v2  ;;  %v3726_v7 = vld [vmem:[%s4596_s19 + $0x8] ss:$16 sps:$4 sm:$0xff]   ;;  %v3727_v9 = vld [vmem:[%s4596_s19 + $0x24] ss:$16 sps:$4 sm:$0xff]   ;;  %v3729_v10 = vld [vmem:[%s4596_s19] ss:$16 sps:$4 sm:$0xff]  }
 0x121   : > { %1077 = vrot.lane.b32.xlu1 %v4632_v5, %s4136_s3  ;;  %v4637_v8 = vsel %vm831_vm1, %v3723_v1, %v871_v4  ;;  %v4643_v11 = vsel %vm834_vm2, %v3725_v3, %v874_v6  ;;  %vm832_vm3 = vcmp.ge.bf16.partialorder %v3726_v7, 0  ;;  %v872_v12 = vmul.bf16 1036860877, %v3726_v7  ;;  %v3730_v13 = vld [vmem:[%s4596_s19 + $0x2c] ss:$16 sps:$4 sm:$0xff]   ;;  %v3739_v32 = vld [vmem:[%s4604_s18 + $0x10] sm:$0xff]  }
 0x122   : > { %1073 = vrot.lane.b32.xlu0 %v4637_v8, %s4136_s3  ;;  %vm836_vm4 = vcmp.ge.bf16.partialorder %v3727_v9, 0  ;;  %v876_v14 = vmul.bf16 1036860877, %v3727_v9  ;;  %v870_v15 = vmul.bf16 1036860877, %v3729_v10  ;;  %vm830_vm5 = vcmp.ge.bf16.partialorder %v3729_v10, 0 }
 0x123   : > { %v4646_v16 = vsel %vm832_vm3, %v3726_v7, %v872_v12  ;;  %v3732_v17 = vld [vmem:[%s4596_s19 + $0x28] ss:$16 sps:$4 sm:$0xff]   ;;  %v878_v19 = vmul.bf16 1036860877, %v3730_v13  ;;  %v3733_v20 = vld [vmem:[%s4596_s19 + $0x20] ss:$16 sps:$4 sm:$0xff]  }
 0x124   : > { %v4653_v18 = vsel %vm836_vm4, %v3727_v9, %v876_v14  ;;  %v4656_v21 = vsel %vm830_vm5, %v3729_v10, %v870_v15  ;;  %vm838_vm6 = vcmp.ge.bf16.partialorder %v3730_v13, 0  ;;  %v877_v22 = vmul.bf16 1036860877, %v3732_v17  ;;  %v3735_v26 = vld [vmem:[%s4596_s19 + $0x48] ss:$16 sps:$4 sm:$0xff]   ;;  %v3753_v60 = vld [vmem:[%s4604_s18 + $0x20] sm:$0xff]  }
 0x125   : > { %1079 = vrot.lane.b32.xlu1 %v4643_v11, %s4136_s3  ;;  %vm837_vm7 = vcmp.ge.bf16.partialorder %v3732_v17, 0  ;;  %v4663_v24 = vsel %vm838_vm6, %v3730_v13, %v878_v19  ;;  %v875_v25 = vmul.bf16 1036860877, %v3733_v20  ;;  %vm835_vm8 = vcmp.ge.bf16.partialorder %v3733_v20, 0  ;;  %v3737_v29 = vld [vmem:[%s4596_s19 + $0x44] ss:$16 sps:$4 sm:$0xff]  }
 0x126   : > { %1075 = vrot.lane.b32.xlu0 %v4646_v16, %s4136_s3  ;;  %v4666_v27 = vsel %vm837_vm7, %v3732_v17, %v877_v22  ;;  %v879_v28 = vmul.bf16 1036860877, %v3734_v23  ;;  %v882_v31 = vmul.bf16 1036860877, %v3735_v26  ;;  %vm842_vm10 = vcmp.ge.bf16.partialorder %v3735_v26, 0  ;;  %v3748_v51 = vld [vmem:[%s4604_s18 + $0x18] sm:$0xff]  }
 0x127   : > { %v4673_v30 = vsel %vm835_vm8, %v3733_v20, %v875_v25  ;;  %v881_v34 = vmul.bf16 1036860877, %v3737_v29  ;;  %v3740_v35 = vld [vmem:[%s4596_s19 + $0x4c] ss:$16 sps:$4 sm:$0xff]   ;;  %vm841_vm11 = vcmp.ge.bf16.partialorder %v3737_v29, 0  ;;  %vm844_vm12 = vcmp.ge.bf16.partialorder %v3739_v32, 0 }
 0x128   : > { %v4676_v33 = vsel %vm839_vm9, %v3734_v23, %v879_v28  ;;  %v4683_v36 = vsel %vm842_vm10, %v3735_v26, %v882_v31  ;;  %v884_v37 = vmul.bf16 1036860877, %v3739_v32  ;;  %v3741_v38 = vld [vmem:[%s4596_s19 + $0x64] ss:$16 sps:$4 sm:$0xff]   ;;  %v883_v40 = vmul.bf16 1036860877, %v3740_v35 }
 0x129   : > { %1083 = vrot.lane.b32.xlu1 %v4653_v18, %s4136_s3  ;;  %v4686_v39 = vsel %vm841_vm11, %v3737_v29, %v881_v34  ;;  %v3743_v41 = vld [vmem:[%s4596_s19 + $0x40] ss:$16 sps:$4 sm:$0xff]   ;;  %vm843_vm13 = vcmp.ge.bf16.partialorder %v3740_v35, 0  ;;  %v3744_v42 = vld [vmem:[%s4596_s19 + $0x6c] ss:$16 sps:$4 sm:$0xff]   ;;  %vm846_vm14 = vcmp.ge.bf16.partialorder %v3741_v38, 0 }
 0x12a   : > { %1071 = vrot.lane.b32.xlu0 %v4656_v21, %s4136_s3  ;;  %v4694_v43 = vsel %vm844_vm12, %v3739_v32, %v884_v37  ;;  %v886_v44 = vmul.bf16 1036860877, %v3741_v38  ;;  %v4696_v45 = vsel %vm843_vm13, %v3740_v35, %v883_v40  ;;  %v880_v46 = vmul.bf16 1036860877, %v3743_v41  ;;  %v3746_v47 = vld [vmem:[%s4596_s19 + $0x68] ss:$16 sps:$4 sm:$0xff]  }
 0x12b   : > { %vm840_vm15 = vcmp.ge.bf16.partialorder %v3743_v41, 0  ;;  %v888_v49 = vmul.bf16 1036860877, %v3744_v42  ;;  %v3747_v50 = vld [vmem:[%s4596_s19 + $0x60] ss:$16 sps:$4 sm:$0xff]   ;;  %vm848_vm0 = vcmp.ge.bf16.partialorder %v3744_v42, 0 }
 0x12c   : > { %v4703_v48 = vsel %vm846_vm14, %v3741_v38, %v886_v44  ;;  %v4707_v52 = vsel %vm840_vm15, %v3743_v41, %v880_v46  ;;  %v887_v53 = vmul.bf16 1036860877, %v3746_v47  ;;  %v3749_v54 = vld [vmem:[%s4596_s19 + $0x88] ss:$16 sps:$4 sm:$0xff]   ;;  %vm847_vm1 = vcmp.ge.bf16.partialorder %v3746_v47, 0  ;;  %v3767_v40 = vld [vmem:[%s4604_s18 + $0x30] sm:$0xff]  }
 0x12d   : > { %1087 = vrot.lane.b32.xlu1 %v4663_v24, %s4136_s3  ;;  %v3751_v55 = vld [vmem:[%s4596_s19 + $0x84] ss:$16 sps:$4 sm:$0xff]   ;;  %v4715_v56 = vsel %vm848_vm0, %v3744_v42, %v888_v49  ;;  %v885_v57 = vmul.bf16 1036860877, %v3747_v50  ;;  %vm849_vm2 = vcmp.ge.bf16.partialorder %v3748_v51, 0  ;;  %vm845_vm3 = vcmp.ge.bf16.partialorder %v3747_v50, 0 }
 0x12e   : > { %1085 = vrot.lane.b32.xlu0 %v4666_v27, %s4136_s3  ;;  %v889_v58 = vmul.bf16 1036860877, %v3748_v51  ;;  %v4717_v59 = vsel %vm847_vm1, %v3746_v47, %v887_v53  ;;  %v892_v61 = vmul.bf16 1036860877, %v3749_v54  ;;  %v891_v62 = vmul.bf16 1036860877, %v3751_v55 }
 0x12f   : > { %v3754_v63 = vld [vmem:[%s4596_s19 + $0x8c] ss:$16 sps:$4 sm:$0xff]   ;;  %v3755_v0 = vld [vmem:[%s4596_s19 + $0xa4] ss:$16 sps:$4 sm:$0xff]   ;;  %v3757_v1 = vld [vmem:[%s4596_s19 + $0x80] ss:$16 sps:$4 sm:$0xff]   ;;  %v4727_v2 = vsel %vm845_vm3, %v3747_v50, %v885_v57 }
 0x130   : > { %vm852_vm4 = vcmp.ge.bf16.partialorder %v3749_v54, 0  ;;  %v3758_v3 = vld [vmem:[%s4596_s19 + $0xac] ss:$16 sps:$4 sm:$0xff]   ;;  %v3760_v4 = vld [vmem:[%s4596_s19 + $0xa8] ss:$16 sps:$4 sm:$0xff]   ;;  %v4732_v6 = vsel %vm849_vm2, %v3748_v51, %v889_v58  ;;  %vm851_vm5 = vcmp.ge.bf16.partialorder %v3751_v55, 0 }
 0x131   : > { %1081 = vrot.lane.b32.xlu1 %v4673_v30, %s4136_s3  ;;  %vm854_vm6 = vcmp.ge.bf16.partialorder %v3753_v60, 0  ;;  %v3761_v7 = vld [vmem:[%s4596_s19 + $0xa0] ss:$16 sps:$4 sm:$0xff]   ;;  %v894_v9 = vmul.bf16 1036860877, %v3753_v60  ;;  %vm853_vm7 = vcmp.ge.bf16.partialorder %v3754_v63, 0  ;;  %v4739_v13 = vsel %vm852_vm4, %v3749_v54, %v892_v61 }
 0x132   : > { %1089 = vrot.lane.b32.xlu0 %v4676_v33, %s4136_s3  ;;  %v3762_v10 = vld [vmem:[%s4604_s18 + $0x28] sm:$0xff]   ;;  %v893_v14 = vmul.bf16 1036860877, %v3754_v63  ;;  %v896_v15 = vmul.bf16 1036860877, %v3755_v0  ;;  %vm856_vm8 = vcmp.ge.bf16.partialorder %v3755_v0, 0  ;;  %v4745_v22 = vsel %vm851_vm5, %v3751_v55, %v891_v62 }
 0x133   : > { %v3763_v12 = vld [vmem:[%s4596_s19 + $0xc8] ss:$16 sps:$4 sm:$0xff]   ;;  %v3765_v17 = vld [vmem:[%s4596_s19 + $0xc4] ss:$16 sps:$4 sm:$0xff]   ;;  %vm850_vm9 = vcmp.ge.bf16.partialorder %v3757_v1, 0  ;;  %vm858_vm10 = vcmp.ge.bf16.partialorder %v3758_v3, 0  ;;  %v4752_v31 = vsel %vm854_vm6, %v3753_v60, %v894_v9 }
 0x134   : > { %v890_v19 = vmul.bf16 1036860877, %v3757_v1  ;;  %v898_v20 = vmul.bf16 1036860877, %v3758_v3  ;;  %v897_v23 = vmul.bf16 1036860877, %v3760_v4  ;;  %v4755_v32 = vsel %vm853_vm7, %v3754_v63, %v893_v14 }
 0x135   : > { %1095 = vrot.lane.b32.xlu1 %v4683_v36, %s4136_s3  ;;  %v895_v25 = vmul.bf16 1036860877, %v3761_v7  ;;  %vm857_vm11 = vcmp.ge.bf16.partialorder %v3760_v4, 0  ;;  %v899_v26 = vmul.bf16 1036860877, %v3762_v10  ;;  %vm855_vm12 = vcmp.ge.bf16.partialorder %v3761_v7, 0 }
 0x136   : > { %1093 = vrot.lane.b32.xlu0 %v4686_v39, %s4136_s3  ;;  %v902_v28 = vmul.bf16 1036860877, %v3763_v12  ;;  %v901_v29 = vmul.bf16 1036860877, %v3765_v17  ;;  %vm859_vm13 = vcmp.ge.bf16.partialorder %v3762_v10, 0  ;;  %v4762_v34 = vsel %vm856_vm8, %v3755_v0, %v896_v15  ;;  %s4138_s8 = smov 124  }
 0x137   : > { %v4765_v35 = vsel %vm850_vm9, %v3757_v1, %v890_v19  ;;  %vm862_vm14 = vcmp.ge.bf16.partialorder %v3763_v12, 0  ;;  %vm861_vm15 = vcmp.ge.bf16.partialorder %v3765_v17, 0  ;;  %v4772_v37 = vsel %vm858_vm10, %v3758_v3, %v898_v20  ;;  %v3768_v41 = vld [vmem:[%s4596_s19 + $0xcc] ss:$16 sps:$4 sm:$0xff]   ;;  %v3769_v49 = vld [vmem:[%s4596_s19 + $0xe4] ss:$16 sps:$4 sm:$0xff]  }
 0x138   : > { %v4775_v38 = vsel %vm857_vm11, %v3760_v4, %v897_v23  ;;  %v4784_v42 = vsel %vm855_vm12, %v3761_v7, %v895_v25  ;;  %v4787_v44 = vsel %vm859_vm13, %v3762_v10, %v899_v26  ;;  %v4793_v46 = vsel %vm862_vm14, %v3763_v12, %v902_v28  ;;  %v3771_v53 = vld [vmem:[%s4596_s19 + $0xc0] ss:$16 sps:$4 sm:$0xff]   ;;  %v3772_v57 = vld [vmem:[%s4596_s19 + $0xec] ss:$16 sps:$4 sm:$0xff]   ;;  %v3774_v61 = vld [vmem:[%s4596_s19 + $0xe8] ss:$16 sps:$4 sm:$0xff]  }
 0x139   : > { %1099 = vrot.lane.b32.xlu1 %v4694_v43, %s4136_s3  ;;  %v904_v47 = vmul.bf16 1036860877, %v3767_v40  ;;  %v4797_v50 = vsel %vm861_vm15, %v3765_v17, %v901_v29  ;;  %vm864_vm0 = vcmp.ge.bf16.partialorder %v3767_v40, 0  ;;  %v903_v51 = vmul.bf16 1036860877, %v3768_v41  ;;  %v3776_v4 = vld [vmem:[%s4604_s18 + $0x38] sm:$0xff]  }
 0x13a   : > { %1097 = vrot.lane.b32.xlu0 %v4696_v45, %s4136_s3  ;;  %vm863_vm1 = vcmp.ge.bf16.partialorder %v3768_v41, 0  ;;  %v906_v55 = vmul.bf16 1036860877, %v3769_v49  ;;  %vm866_vm2 = vcmp.ge.bf16.partialorder %v3769_v49, 0  ;;  %v900_v60 = vmul.bf16 1036860877, %v3771_v53 }
 0x13b   : > { %v4804_v54 = vsel %vm864_vm0, %v3767_v40, %v904_v47  ;;  %v4807_v58 = vsel %vm863_vm1, %v3768_v41, %v903_v51  ;;  %vm860_vm3 = vcmp.ge.bf16.partialorder %v3771_v53, 0  ;;  %v908_v63 = vmul.bf16 1036860877, %v3772_v57  ;;  %v3775_v0 = vld [vmem:[%s4596_s19 + $0xe0] ss:$16 sps:$4 sm:$0xff]   ;;  %s6049_s10 = sld [smem:[#allocation24_spill]] }
 0x13c   : > { %v4814_v62 = vsel %vm866_vm2, %v3769_v49, %v906_v55  ;;  %v4817_v1 = vsel %vm860_vm3, %v3771_v53, %v900_v60  ;;  %vm868_vm4 = vcmp.ge.bf16.partialorder %v3772_v57, 0  ;;  %v907_v3 = vmul.bf16 1036860877, %v3774_v61  ;;  %s6050_s30 = sld [smem:[#allocation51_spill]]  ;;  %s5229_s21 = scalar_lea.vmem [#allocation10], %s4620_s22 }
 0x13d   : > { %1103 = vrot.lane.b32.xlu1 %v4703_v48, %s4136_s3  ;;  %vm867_vm5 = vcmp.ge.bf16.partialorder %v3774_v61, 0  ;;  %v4137_v7 = vmov 0   ;;  %v4827_v9 = vsel %vm868_vm4, %v3772_v57, %v908_v63  ;;  %v905_v10 = vmul.bf16 1036860877, %v3775_v0  ;;  %s5521_s17 = scalar_lea.vmem [#allocation11], %s4620_s22  ;;  %s5829_s9 = scalar_lea.sflag [#allocation4], %s475_s11 }
 0x13e   : > { %1091 = vrot.lane.b32.xlu0 %v4707_v52, %s4136_s3  ;;  %1248 = vmatprep.mubr.bf16.mxu0 %v4137_v7  ;;  %v4830_v12 = vsel %vm867_vm5, %v3774_v61, %v907_v3  ;;  %vm865_vm6 = vcmp.ge.bf16.partialorder %v3775_v0, 0  ;;  %v909_v14 = vmul.bf16 1036860877, %v3776_v4  ;;  %vm869_vm7 = vcmp.ge.bf16.partialorder %v3776_v4, 0 }
 0x13f   : > { %1361 = vmatprep.mubr.bf16.mxu1 %v4137_v7  ;;  %3719 = vset.pattern.permute.xlu0 %v4137_v7  ;;  %v4836_v15 = vsel %vm865_vm6, %v3775_v0, %v905_v10  ;;  %vm1151_vm8 = vcmask 1031168   ;;  %vm1861_vm9 = vcmask 1014784  }
 0x140   : > { %3720 = vset.pattern.permute.xlu1 %v4137_v7  ;;  %v4838_v17 = vsel %vm869_vm7, %v3776_v4, %v909_v14 }
 0x141   : > { %1107 = vrot.lane.b32.xlu1 %v4715_v56, %s4136_s3  ;;  %s3203_s19 = sshll.u32 %s6049_s10, 4 }
 0x142   : > { %1105 = vrot.lane.b32.xlu0 %v4717_v59, %s4136_s3  ;;  %p549_p9 = scmp.lt.s32.totalorder %s3203_s19, 31 }
 0x144   : > { %s6220_s19 = smov (!%p549_p9, %s3203_s19), 31 }
 0x145   : > { %1101 = vrot.lane.b32.xlu1 %v4727_v2, %s4136_s3  ;;  %s3204_s7 = sshll.u32 %s6220_s19, 3 }
 0x146   : > { %1109 = vrot.lane.b32.xlu0 %v4732_v6, %s4136_s3  ;;  %s5087_s18 = scalar_lea.vmem %s6050_s30, %s3204_s7 }
 0x149   : > { %1115 = vrot.lane.b32.xlu1 %v4739_v13, %s4136_s3 }
 0x14a   : > { %1113 = vrot.lane.b32.xlu0 %v4745_v22, %s4136_s3 }
 0x14d   : > { %1119 = vrot.lane.b32.xlu1 %v4752_v31, %s4136_s3 }
 0x14e   : > { %1117 = vrot.lane.b32.xlu0 %v4755_v32, %s4136_s3 }
 0x151   : > { %1123 = vrot.lane.b32.xlu1 %v4762_v34, %s4136_s3 }
 0x152   : > { %1111 = vrot.lane.b32.xlu0 %v4765_v35, %s4136_s3 }
 0x155   : > { %1127 = vrot.lane.b32.xlu1 %v4772_v37, %s4136_s3 }
 0x156   : > { %1125 = vrot.lane.b32.xlu0 %v4775_v38, %s4136_s3 }
 0x159   : > { %1121 = vrot.lane.b32.xlu1 %v4784_v42, %s4136_s3 }
 0x15a   : > { %1129 = vrot.lane.b32.xlu0 %v4787_v44, %s4136_s3 }
 0x15d   : > { %1135 = vrot.lane.b32.xlu1 %v4793_v46, %s4136_s3 }
 0x15e   : > { %1133 = vrot.lane.b32.xlu0 %v4797_v50, %s4136_s3 }
 0x161   : > { %1139 = vrot.lane.b32.xlu1 %v4804_v54, %s4136_s3 }
 0x162   : > { %1137 = vrot.lane.b32.xlu0 %v4807_v58, %s4136_s3 }
 0x165   : > { %1143 = vrot.lane.b32.xlu1 %v4814_v62, %s4136_s3 }
 0x166   : > { %1131 = vrot.lane.b32.xlu0 %v4817_v1, %s4136_s3 }
 0x169   : > { %1147 = vrot.lane.b32.xlu1 %v4827_v9, %s4136_s3 }
 0x16a   : > { %1145 = vrot.lane.b32.xlu0 %v4830_v12, %s4136_s3 }
 0x16d   : > { %1141 = vrot.lane.b32.xlu1 %v4836_v15, %s4136_s3 }
 0x16e   : > { %1149 = vrot.lane.b32.xlu0 %v4838_v17, %s4136_s3 }
 0x171   : > { %1785 = vrot.lane.b32.xlu1 %v4646_v16, %s4138_s8 }
 0x172   : > { %1783 = vrot.lane.b32.xlu0 %v4637_v8, %s4138_s8 }
 0x175   : > { %1789 = vrot.lane.b32.xlu1 %v4643_v11, %s4138_s8 }
 0x176   : > { %1787 = vrot.lane.b32.xlu0 %v4632_v5, %s4138_s8 }
 0x179   : > { %1793 = vrot.lane.b32.xlu1 %v4653_v18, %s4138_s8 }
 0x17a   : > { %1781 = vrot.lane.b32.xlu0 %v4656_v21, %s4138_s8 }
 0x17d   : > { %1797 = vrot.lane.b32.xlu1 %v4663_v24, %s4138_s8 }
 0x17e   : > { %1795 = vrot.lane.b32.xlu0 %v4666_v27, %s4138_s8 }
 0x181   : > { %1791 = vrot.lane.b32.xlu1 %v4673_v30, %s4138_s8 }
 0x182   : > { %1799 = vrot.lane.b32.xlu0 %v4676_v33, %s4138_s8 }
 0x185   : > { %1805 = vrot.lane.b32.xlu1 %v4683_v36, %s4138_s8 }
 0x186   : > { %1803 = vrot.lane.b32.xlu0 %v4686_v39, %s4138_s8 }
 0x189   : > { %1809 = vrot.lane.b32.xlu1 %v4694_v43, %s4138_s8 }
 0x18a   : > { %1807 = vrot.lane.b32.xlu0 %v4696_v45, %s4138_s8 }
 0x18d   : > { %1813 = vrot.lane.b32.xlu1 %v4703_v48, %s4138_s8 }
 0x18e   : > { %1801 = vrot.lane.b32.xlu0 %v4707_v52, %s4138_s8 }
 0x191   : > { %1817 = vrot.lane.b32.xlu1 %v4715_v56, %s4138_s8 }
 0x192   : > { %1815 = vrot.lane.b32.xlu0 %v4717_v59, %s4138_s8 }
 0x193   : > { %v1078_v11 = vpop.permute.xlu1 %1077 }
 0x194   : > { %v1074_v33 = vpop.permute.xlu0 %1073 }
 0x195   : > { %1811 = vrot.lane.b32.xlu1 %v4727_v2, %s4138_s8 }
 0x196   : > { %1819 = vrot.lane.b32.xlu0 %v4732_v6, %s4138_s8 }
 0x197   : > { %v1080_v43 = vpop.permute.xlu1 %1079 }
 0x198   : > { %v1076_v19 = vpop.permute.xlu0 %1075  ;;  %v1155_v20 = vsel %vm1151_vm8, %v1078_v11, %v1080_v43 }
 0x199   : > { %v1153_v23 = vsel %vm1151_vm8, %v1074_v33, %v1076_v19  ;;  %1329 = vmatprep.subr.bf16.mxu1 %v1155_v20  ;;  %v1154_v25 = vsel %vm1151_vm8, %v1076_v19, %v1078_v11  ;;  %1825 = vrot.lane.b32.xlu1 %v4739_v13, %s4138_s8 }
 0x19a   : > { %1216 = vmatprep.subr.bf16.mxu0 %v1153_v23  ;;  %1330 = vmatpush1.bf16.msra.mxu1 %v1154_v25 }
 0x19b   : > { %v1084_v26 = vpop.permute.xlu1 %1083  ;;  %1823 = vrot.lane.b32.xlu0 %v4745_v22, %s4138_s8 }
 0x19c   : > { %v1072_v28 = vpop.permute.xlu0 %1071 }
 0x19d   : > { %v1152_v6 = vsel %vm1151_vm8, %v1072_v28, %v1074_v33  ;;  %1829 = vrot.lane.b32.xlu1 %v4752_v31, %s4138_s8 }
 0x19e   : > { %1217 = vmatpush1.bf16.msra.mxu0 %v1152_v6 }
 0x19f   : > { %v1088_v29 = vpop.permute.xlu1 %1087  ;;  %1827 = vrot.lane.b32.xlu0 %v4755_v32, %s4138_s8 }
 0x1a0   : > { %v1086_v40 = vpop.permute.xlu0 %1085 }
 0x1a1   : > { %v1157_v41 = vsel %vm1151_vm8, %v1084_v26, %v1086_v40  ;;  %1833 = vrot.lane.b32.xlu1 %v4762_v34, %s4138_s8  ;;  %v1158_v53 = vsel %vm1151_vm8, %v1086_v40, %v1088_v29 }
 0x1a2   : > { %1218 = vmatprep.subr.bf16.mxu0 %v1157_v41 }
 0x1a3   : > { %v1082_v47 = vpop.permute.xlu1 %1081  ;;  %1821 = vrot.lane.b32.xlu0 %v4765_v35, %s4138_s8 }
 0x1a4   : > { %v1090_v49 = vpop.permute.xlu0 %1089  ;;  %v1156_v51 = vsel %vm1151_vm8, %v1082_v47, %v1084_v26 }
 0x1a5   : > { %1219 = vmatpush1.bf16.msra.mxu0 %v1156_v51  ;;  %v1159_v31 = vsel %vm1151_vm8, %v1088_v29, %v1090_v49  ;;  %1837 = vrot.lane.b32.xlu1 %v4772_v37, %s4138_s8 }
 0x1a6   : > { %1331 = vmatprep.subr.bf16.mxu1 %v1159_v31 }
 0x1a7   : > { %1332 = vmatpush1.bf16.msra.mxu1 %v1158_v53  ;;  %v1096_v55 = vpop.permute.xlu1 %1095  ;;  %1835 = vrot.lane.b32.xlu0 %v4775_v38, %s4138_s8 }
 0x1a8   : > { %v1094_v57 = vpop.permute.xlu0 %1093 }
 0x1a9   : > { %v1161_v60 = vsel %vm1151_vm8, %v1094_v57, %v1096_v55  ;;  %1831 = vrot.lane.b32.xlu1 %v4784_v42, %s4138_s8 }
 0x1aa   : > { %1220 = vmatprep.subr.bf16.mxu0 %v1161_v60 }
 0x1ab   : > { %v1100_v61 = vpop.permute.xlu1 %1099  ;;  %1839 = vrot.lane.b32.xlu0 %v4787_v44, %s4138_s8 }
 0x1ac   : > { %v1098_v63 = vpop.permute.xlu0 %1097 }
 0x1ad   : > { %v1163_v0 = vsel %vm1151_vm8, %v1098_v63, %v1100_v61  ;;  %v1162_v3 = vsel %vm1151_vm8, %v1096_v55, %v1098_v63  ;;  %1845 = vrot.lane.b32.xlu1 %v4793_v46, %s4138_s8 }
 0x1ae   : > { %1333 = vmatprep.subr.bf16.mxu1 %v1163_v0 }
 0x1af   : > { %1334 = vmatpush1.bf16.msra.mxu1 %v1162_v3  ;;  %v1104_v4 = vpop.permute.xlu1 %1103  ;;  %1843 = vrot.lane.b32.xlu0 %v4797_v50, %s4138_s8 }
 0x1b0   : > { %v1092_v10 = vpop.permute.xlu0 %1091 }
 0x1b1   : > { %v1160_v14 = vsel %vm1151_vm8, %v1092_v10, %v1094_v57  ;;  %1849 = vrot.lane.b32.xlu1 %v4804_v54, %s4138_s8 }
 0x1b2   : > { %1221 = vmatpush1.bf16.msra.mxu0 %v1160_v14 }
 0x1b3   : > { %v1108_v44 = vpop.permute.xlu1 %1107  ;;  %1847 = vrot.lane.b32.xlu0 %v4807_v58, %s4138_s8 }
 0x1b4   : > { %v1106_v11 = vpop.permute.xlu0 %1105 }
 0x1b5   : > { %v1165_v33 = vsel %vm1151_vm8, %v1104_v4, %v1106_v11  ;;  %1853 = vrot.lane.b32.xlu1 %v4814_v62, %s4138_s8  ;;  %v1166_v23 = vsel %vm1151_vm8, %v1106_v11, %v1108_v44 }
 0x1b6   : > { %1222 = vmatprep.subr.bf16.mxu0 %v1165_v33 }
 0x1b7   : > { %v1102_v43 = vpop.permute.xlu1 %1101  ;;  %1841 = vrot.lane.b32.xlu0 %v4817_v1, %s4138_s8 }
 0x1b8   : > { %v1110_v19 = vpop.permute.xlu0 %1109  ;;  %v1164_v20 = vsel %vm1151_vm8, %v1102_v43, %v1104_v4 }
 0x1b9   : > { %1223 = vmatpush1.bf16.msra.mxu0 %v1164_v20  ;;  %v1167_v54 = vsel %vm1151_vm8, %v1108_v44, %v1110_v19  ;;  %1857 = vrot.lane.b32.xlu1 %v4827_v9, %s4138_s8 }
 0x1ba   : > { %1335 = vmatprep.subr.bf16.mxu1 %v1167_v54 }
 0x1bb   : > { %1336 = vmatpush1.bf16.msra.mxu1 %v1166_v23  ;;  %v1116_v25 = vpop.permute.xlu1 %1115  ;;  %1855 = vrot.lane.b32.xlu0 %v4830_v12, %s4138_s8 }
 0x1bc   : > { %v1114_v26 = vpop.permute.xlu0 %1113 }
 0x1bd   : > { %v1169_v28 = vsel %vm1151_vm8, %v1114_v26, %v1116_v25  ;;  %1851 = vrot.lane.b32.xlu1 %v4836_v15, %s4138_s8 }
 0x1be   : > { %1224 = vmatprep.subr.bf16.mxu0 %v1169_v28 }
 0x1bf   : > { %v1120_v6 = vpop.permute.xlu1 %1119  ;;  %1859 = vrot.lane.b32.xlu0 %v4838_v17, %s4138_s8 }
 0x1c0   : > { %v1118_v29 = vpop.permute.xlu0 %1117 }
 0x1c1   : > { %v1171_v40 = vsel %vm1151_vm8, %v1118_v29, %v1120_v6  ;;  %v1170_v41 = vsel %vm1151_vm8, %v1116_v25, %v1118_v29  ;;  %v3777_v6 = vld [vmem:[%s4611_s20 + $0x40] sm:$0xff]  }
 0x1c2   : > { %1337 = vmatprep.subr.bf16.mxu1 %v1171_v40 }
 0x1c3   : > { %1338 = vmatpush1.bf16.msra.mxu1 %v1170_v41  ;;  %v1124_v47 = vpop.permute.xlu1 %1123 }
 0x1c4   : > { %v1112_v49 = vpop.permute.xlu0 %1111 }
 0x1c5   : > { %v1168_v51 = vsel %vm1151_vm8, %v1112_v49, %v1114_v26  ;;  %v3778_v49 = vld [vmem:[%s4611_s20 + $0x48] sm:$0xff]  }
 0x1c6   : > { %1225 = vmatpush1.bf16.msra.mxu0 %v1168_v51 }
 0x1c7   : > { %v1128_v31 = vpop.permute.xlu1 %1127 }
 0x1c8   : > { %v1126_v53 = vpop.permute.xlu0 %1125 }
 0x1c9   : > { %v1173_v55 = vsel %vm1151_vm8, %v1124_v47, %v1126_v53  ;;  %v1174_v63 = vsel %vm1151_vm8, %v1126_v53, %v1128_v31 }
 0x1ca   : > { %1226 = vmatprep.subr.bf16.mxu0 %v1173_v55 }
 0x1cb   : > { %v1122_v57 = vpop.permute.xlu1 %1121 }
 0x1cc   : > { %v1130_v60 = vpop.permute.xlu0 %1129  ;;  %v1172_v17 = vsel %vm1151_vm8, %v1122_v57, %v1124_v47  ;;  %v3785_v57 = vld [vmem:[%s4611_s20] sm:$0xff]  }
 0x1cd   : > { %1227 = vmatpush1.bf16.msra.mxu0 %v1172_v17  ;;  %v1175_v61 = vsel %vm1151_vm8, %v1128_v31, %v1130_v60 }
 0x1ce   : > { %1339 = vmatprep.subr.bf16.mxu1 %v1175_v61 }
 0x1cf   : > { %1340 = vmatpush1.bf16.msra.mxu1 %v1174_v63  ;;  %v1136_v0 = vpop.permute.xlu1 %1135 }
 0x1d0   : > { %v1134_v3 = vpop.permute.xlu0 %1133 }
 0x1d1   : > { %v1177_v4 = vsel %vm1151_vm8, %v1134_v3, %v1136_v0 }
 0x1d2   : > { %1228 = vmatprep.subr.bf16.mxu0 %v1177_v4  ;;  %v2217_v4 = vld [vmem:[%s5087_s18 + $0x8] sm:$0xff] }
 0x1d3   : > { %v1140_v10 = vpop.permute.xlu1 %1139  ;;  %2239 = vperm.xlu1 %3720, %v2217_v4   ;;  %v3799_v4 = vld [vmem:[%s4611_s20 + $0xb0] sm:$0xff]  }
 0x1d4   : > { %v1138_v14 = vpop.permute.xlu0 %1137 }
 0x1d5   : > { %v1179_v44 = vsel %vm1151_vm8, %v1138_v14, %v1140_v10  ;;  %v1178_v11 = vsel %vm1151_vm8, %v1136_v0, %v1138_v14  ;;  %v2216_v0 = vld [vmem:[%s5087_s18] sm:$0xff] }
 0x1d6   : > { %1341 = vmatprep.subr.bf16.mxu1 %v1179_v44  ;;  %2234 = vperm.xlu0 %3719, %v2216_v0   ;;  %v3797_v0 = vld [vmem:[%s4611_s20 + $0xa0] sm:$0xff]  }
 0x1d7   : > { %1342 = vmatpush1.bf16.msra.mxu1 %v1178_v11  ;;  %v1144_v33 = vpop.permute.xlu1 %1143  ;;  %v3786_v11 = vld [vmem:[%s4611_s20 + $0x8] sm:$0xff]  }
 0x1d8   : > { %v1132_v43 = vpop.permute.xlu0 %1131 }
 0x1d9   : > { %v1176_v19 = vsel %vm1151_vm8, %v1132_v43, %v1134_v3 }
 0x1da   : > { %1229 = vmatpush1.bf16.msra.mxu0 %v1176_v19 }
 0x1db   : > { %v1148_v20 = vpop.permute.xlu1 %1147 }
 0x1dc   : > { %v1146_v54 = vpop.permute.xlu0 %1145 }
 0x1dd   : > { %v1181_v23 = vsel %vm1151_vm8, %v1144_v33, %v1146_v54  ;;  %v1182_v40 = vsel %vm1151_vm8, %v1146_v54, %v1148_v20 }
 0x1de   : > { %1230 = vmatprep.subr.bf16.mxu0 %v1181_v23 }
 0x1df   : > { %v1142_v25 = vpop.permute.xlu1 %1141 }
 0x1e0   : > { %v1150_v26 = vpop.permute.xlu0 %1149  ;;  %v1180_v28 = vsel %vm1151_vm8, %v1142_v25, %v1144_v33 }
 0x1e1   : > { %1231 = vmatpush1.bf16.msra.mxu0 %v1180_v28  ;;  %v1183_v29 = vsel %vm1151_vm8, %v1148_v20, %v1150_v26  ;;  %v2218_v26 = vld [vmem:[%s5087_s18 + $0x10] sm:$0xff] }
 0x1e2   : > { %1343 = vmatprep.subr.bf16.mxu1 %v1183_v29  ;;  %1490 = vmatprep.subr.bf16.mxu0 %v4637_v8  ;;  %v2219_v29 = vld [vmem:[%s5087_s18 + $0x18] sm:$0xff] }
 0x1e3   : > { %1344 = vmatpush1.bf16.msra.mxu1 %v1182_v40  ;;  %v4958_v41 = vpop.permute.xlu1 %1785  ;;  %2244 = vperm.xlu1 %3720, %v2218_v26   ;;  %v5254_v26 = vld [vmem:[%s5229_s21 + $0x18] sm:$0xff] }
 0x1e4   : > { %1249 = vmatmul.mubr.bf16.vlgmr.msra.gmra.mrb[0].mxu0 %v3777_v6  ;;  %1603 = vmatprep.subr.bf16.mxu1 %v4632_v5  ;;  %v4961_v47 = vpop.permute.xlu0 %1783 }
 0x1e5   : > { %1491 = vmatpush1.bf16.msra.mxu0 %v4656_v21  ;;  %1258 = vmatprep.mubr.bf16.mxu0 %v4137_v7  ;;  %v3779_v21 = vld [vmem:[%s4611_s20 + $0x50] sm:$0xff]  }
 0x1e6   : > { %1362 = vmatmul.mubr.bf16.vlgmr.msra.gmra.mrb[0].mxu1 %v3777_v6  ;;  %1492 = vmatprep.subr.bf16.mxu0 %v4653_v18 }
 0x1e7   : > { %1604 = vmatpush1.bf16.msra.mxu1 %v4646_v16  ;;  %1371 = vmatprep.mubr.bf16.mxu1 %v4137_v7  ;;  %v1790_v8 = vpop.permute.xlu1 %1789 }
 0x1e8   : > { %1605 = vmatprep.subr.bf16.mxu1 %v4663_v24  ;;  %v4970_v51 = vpop.permute.xlu0 %1787  ;;  %2249 = vperm.xlu0 %3719, %v2219_v29   ;;  %v5486_v29 = vld [vmem:[%s4623_s24 + $0xd0] sm:$0xff] }
 0x1e9   : > { %1493 = vmatpush1.bf16.msra.mxu0 %v4673_v30  ;;  %v1864_v3 = vsel %vm1861_vm9, %v4958_v41, %v4970_v51 }
 0x1ea   : > { %1494 = vmatprep.subr.bf16.mxu0 %v4686_v39  ;;  %v3780_v39 = vld [vmem:[%s4611_s20 + $0x58] sm:$0xff]  }
 0x1eb   : > { %1606 = vmatpush1.bf16.msra.mxu1 %v4666_v27  ;;  %v4975_v5 = vpop.permute.xlu1 %1793 }
 0x1ec   : > { %1259 = vmatmul.mubr.bf16.gmra.mrb[4].mxu0 %v3778_v49  ;;  %1607 = vmatprep.subr.bf16.mxu1 %v4696_v45  ;;  %v4978_v16 = vpop.permute.xlu0 %1781 }
 0x1ed   : > { %1268 = vmatprep.mubr.bf16.mxu0 %v4137_v7  ;;  %1495 = vmatpush1.bf16.msra.mxu0 %v4707_v52  ;;  %v1862_v17 = vsel %vm1861_vm9, %v4978_v16, %v4961_v47 }
 0x1ee   : > { %1372 = vmatmul.mubr.bf16.gmra.mrb[4].mxu1 %v3778_v49  ;;  %1496 = vmatprep.subr.bf16.mxu0 %v4703_v48 }
 0x1ef   : > { %1381 = vmatprep.mubr.bf16.mxu1 %v4137_v7  ;;  %1608 = vmatpush1.bf16.msra.mxu1 %v4683_v36  ;;  %v4985_v18 = vpop.permute.xlu1 %1797 }
 0x1f0   : > { %1609 = vmatprep.subr.bf16.mxu1 %v4715_v56  ;;  %v4989_v24 = vpop.permute.xlu0 %1795  ;;  %v1863_v56 = vsel %vm1861_vm9, %v4961_v47, %v4958_v41 }
 0x1f1   : > { %1497 = vmatpush1.bf16.msra.mxu0 %v4727_v2  ;;  %v3781_v2 = vld [vmem:[%s4611_s20 + $0x60] sm:$0xff]   ;;  %v1867_v63 = vsel %vm1861_vm9, %v4975_v5, %v4989_v24  ;;  %v1868_v19 = vsel %vm1861_vm9, %v4989_v24, %v4985_v18 }
 0x1f2   : > { %1498 = vmatprep.subr.bf16.mxu0 %v4745_v22  ;;  %v1865_v22 = vsel %vm1861_vm9, %v4970_v51, %v1790_v8  ;;  %v3787_v8 = vld [vmem:[%s4611_s20 + $0x10] sm:$0xff]  }
 0x1f3   : > { %1610 = vmatpush1.bf16.msra.mxu1 %v4717_v59  ;;  %v4994_v27 = vpop.permute.xlu1 %1791 }
 0x1f4   : > { %1269 = vmatmul.mubr.bf16.gmra.mrb[8].mxu0 %v3779_v21  ;;  %1611 = vmatprep.subr.bf16.mxu1 %v4755_v32  ;;  %v4997_v30 = vpop.permute.xlu0 %1799  ;;  %v1866_v44 = vsel %vm1861_vm9, %v4994_v27, %v4975_v5 }
 0x1f5   : > { %1278 = vmatprep.mubr.bf16.mxu0 %v4137_v7  ;;  %1499 = vmatpush1.bf16.msra.mxu0 %v4765_v35  ;;  %v1869_v10 = vsel %vm1861_vm9, %v4985_v18, %v4997_v30  ;;  %v2220_v30 = vld [vmem:[%s5087_s18 + $0x20] sm:$0xff] }
 0x1f6   : > { %1382 = vmatmul.mubr.bf16.gmra.mrb[8].mxu1 %v3779_v21  ;;  %1500 = vmatprep.subr.bf16.mxu0 %v4762_v34 }
 0x1f7   : > { %1391 = vmatprep.mubr.bf16.mxu1 %v4137_v7  ;;  %1612 = vmatpush1.bf16.msra.mxu1 %v4739_v13  ;;  %v5004_v36 = vpop.permute.xlu1 %1805 }
 0x1f8   : > { %1613 = vmatprep.subr.bf16.mxu1 %v4772_v37  ;;  %v5008_v45 = vpop.permute.xlu0 %1803  ;;  %v3782_v37 = vld [vmem:[%s4611_s20 + $0x68] sm:$0xff]   ;;  %2254 = vperm.xlu1 %3720, %v2220_v30  }
 0x1f9   : > { %1501 = vmatpush1.bf16.msra.mxu0 %v4784_v42  ;;  %v1871_v14 = vsel %vm1861_vm9, %v5008_v45, %v5004_v36  ;;  %v5468_v30 = vld [vmem:[%s4623_s24 + $0xc8] sm:$0xff] }
 0x1fa   : > { %1502 = vmatprep.subr.bf16.mxu0 %v4797_v50 }
 0x1fb   : > { %1614 = vmatpush1.bf16.msra.mxu1 %v4775_v38  ;;  %v5013_v48 = vpop.permute.xlu1 %1809 }
 0x1fc   : > { %1279 = vmatmul.mubr.bf16.gmra.mrb[12].mxu0 %v3780_v39  ;;  %1615 = vmatprep.subr.bf16.mxu1 %v4807_v58  ;;  %v5016_v52 = vpop.permute.xlu0 %1807  ;;  %v3783_v58 = vld [vmem:[%s4611_s20 + $0x70] sm:$0xff]  }
 0x1fd   : > { %1288 = vmatprep.mubr.bf16.mxu0 %v4137_v7  ;;  %1503 = vmatpush1.bf16.msra.mxu0 %v4817_v1  ;;  %v1873_v33 = vsel %vm1861_vm9, %v5016_v52, %v5013_v48  ;;  %v1872_v28 = vsel %vm1861_vm9, %v5004_v36, %v5016_v52  ;;  %v3788_v52 = vld [vmem:[%s4611_s20 + $0x18] sm:$0xff]  }
 0x1fe   : > { %1392 = vmatmul.mubr.bf16.gmra.mrb[12].mxu1 %v3780_v39  ;;  %1504 = vmatprep.subr.bf16.mxu0 %v4814_v62  ;;  %v2221_v39 = vld [vmem:[%s5087_s18 + $0x28] sm:$0xff] }
 0x1ff   : > { %1401 = vmatprep.mubr.bf16.mxu1 %v4137_v7  ;;  %1616 = vmatpush1.bf16.msra.mxu1 %v4793_v46  ;;  %v5026_v59 = vpop.permute.xlu1 %1813 }
 0x200   : > { %1617 = vmatprep.subr.bf16.mxu1 %v4827_v9  ;;  %v5030_v13 = vpop.permute.xlu0 %1801  ;;  %2259 = vperm.xlu0 %3719, %v2221_v39   ;;  %v5284_v39 = vld [vmem:[%s5229_s21 + $0x30] sm:$0xff] }
 0x201   : > { %1505 = vmatpush1.bf16.msra.mxu0 %v4836_v15  ;;  %v3784_v15 = vld [vmem:[%s4611_s20 + $0x78] sm:$0xff]   ;;  %v1870_v23 = vsel %vm1861_vm9, %v5030_v13, %v5008_v45 }
 0x202   : > { %1926 = vmatprep.subr.bf16.mxu0 %v1863_v56 }
 0x203   : > { %1618 = vmatpush1.bf16.msra.mxu1 %v4830_v12  ;;  %v5036_v32 = vpop.permute.xlu1 %1817 }
 0x204   : > { %1289 = vmatmul.mubr.bf16.gmra.mrb[16].mxu0 %v3781_v2  ;;  %2039 = vmatprep.subr.bf16.mxu1 %v1865_v22  ;;  %v5038_v34 = vpop.permute.xlu0 %1815 }
 0x205   : > { %1298 = vmatprep.mubr.bf16.mxu0 %v4137_v7  ;;  %v1875_v54 = vsel %vm1861_vm9, %v5026_v59, %v5038_v34  ;;  %v1876_v47 = vsel %vm1861_vm9, %v5038_v34, %v5036_v32 }
 0x206   : > { %1402 = vmatmul.mubr.bf16.gmra.mrb[16].mxu1 %v3781_v2 }
 0x207   : > { %1411 = vmatprep.mubr.bf16.mxu1 %v4137_v7  ;;  %v5042_v35 = vpop.permute.xlu1 %1811 }
 0x208   : > { %v5045_v38 = vpop.permute.xlu0 %1819  ;;  %v1874_v6 = vsel %vm1861_vm9, %v5042_v35, %v5026_v59  ;;  %v2222_v35 = vld [vmem:[%s5087_s18 + $0x30] sm:$0xff] }
 0x209   : > { %v1877_v25 = vsel %vm1861_vm9, %v5036_v32, %v5045_v38  ;;  %v2223_v38 = vld [vmem:[%s5087_s18 + $0x38] sm:$0xff]  ;;  %2264 = vperm.xlu1 %3720, %v2222_v35   ;;  %v5301_v35 = vld [vmem:[%s4623_s24 + $0x40] sm:$0xff] }
 0x20a   : > { %2269 = vperm.xlu0 %3719, %v2223_v38   ;;  %v5307_v38 = vld [vmem:[%s4623_s24 + $0x48] sm:$0xff] }
 0x20b   : > { %v5047_v42 = vpop.permute.xlu1 %1825 }
 0x20c   : > { %1299 = vmatmul.mubr.bf16.gmra.mrb[20].mxu0 %v3782_v37 }
 0x20d   : > { %1308 = vmatprep.mubr.bf16.mxu0 %v4137_v7  ;;  %v5050_v46 = vpop.permute.xlu0 %1823 }
 0x20e   : > { %1412 = vmatmul.mubr.bf16.gmra.mrb[20].mxu1 %v3782_v37  ;;  %v1879_v40 = vsel %vm1861_vm9, %v5050_v46, %v5047_v42 }
 0x20f   : > { %1421 = vmatprep.mubr.bf16.mxu1 %v4137_v7  ;;  %v5053_v50 = vpop.permute.xlu1 %1829 }
 0x211   : > { %v5056_v62 = vpop.permute.xlu0 %1827 }
 0x212   : > { %v1881_v51 = vsel %vm1861_vm9, %v5056_v62, %v5053_v50  ;;  %v1880_v18 = vsel %vm1861_vm9, %v5047_v42, %v5056_v62  ;;  %v3789_v42 = vld [vmem:[%s4611_s20 + $0x20] sm:$0xff]   ;;  %v2226_v62 = vld [vmem:[%s5087_s18 + $0x50] sm:$0xff] }
 0x213   : > { %v5058_v1 = vpop.permute.xlu1 %1833  ;;  %v2224_v50 = vld [vmem:[%s5087_s18 + $0x40] sm:$0xff] }
 0x214   : > { %1309 = vmatmul.mubr.bf16.gmra.mrb[24].mxu0 %v3783_v58  ;;  %2274 = vperm.xlu1 %3720, %v2224_v50   ;;  %v5387_v50 = vld [vmem:[%s4623_s24 + $0x88] sm:$0xff] }
 0x215   : > { %1318 = vmatprep.mubr.bf16.mxu0 %v4137_v7  ;;  %v5061_v9 = vpop.permute.xlu0 %1821 }
 0x216   : > { %1422 = vmatmul.mubr.bf16.gmra.mrb[24].mxu1 %v3783_v58  ;;  %v1878_v5 = vsel %vm1861_vm9, %v5061_v9, %v5050_v46  ;;  %v2225_v58 = vld [vmem:[%s5087_s18 + $0x48] sm:$0xff] }
 0x217   : > { %1431 = vmatprep.mubr.bf16.mxu1 %v4137_v7  ;;  %v5064_v12 = vpop.permute.xlu1 %1837  ;;  %2279 = vperm.xlu0 %3719, %v2225_v58   ;;  %v3790_v9 = vld [vmem:[%s4611_s20 + $0x28] sm:$0xff]  }
 0x218   : > { %2284 = vperm.xlu1 %3720, %v2226_v62   ;;  %v5314_v62 = vld [vmem:[%s5229_s21 + $0x48] sm:$0xff] }
 0x219   : > { %v5067_v31 = vpop.permute.xlu0 %1835 }
 0x21a   : > { %v1883_v16 = vsel %vm1861_vm9, %v5058_v1, %v5067_v31  ;;  %v1884_v48 = vsel %vm1861_vm9, %v5067_v31, %v5064_v12  ;;  %v2230_v31 = vld [vmem:[%s5087_s18 + $0x70] sm:$0xff] }
 0x21b   : > { %v5070_v53 = vpop.permute.xlu1 %1831 }
 0x21c   : > { %1319 = vmatmul.mubr.bf16.gmra.mrb[28].mxu0 %v3784_v15  ;;  %v1882_v36 = vsel %vm1861_vm9, %v5070_v53, %v5058_v1  ;;  %v2227_v1 = vld [vmem:[%s5087_s18 + $0x58] sm:$0xff] }
 0x21d   : > { %1522 = vmatprep.mubr.bf16.mxu0 %v4137_v7  ;;  %v5072_v55 = vpop.permute.xlu0 %1839  ;;  %2289 = vperm.xlu0 %3719, %v2227_v1   ;;  %v2231_v53 = vld [vmem:[%s5087_s18 + $0x78] sm:$0xff]  ;;  %v5317_v1 = vld [vmem:[%s4623_s24 + $0x50] sm:$0xff] }
 0x21e   : > { %1432 = vmatmul.mubr.bf16.gmra.mrb[28].mxu1 %v3784_v15  ;;  %v1885_v24 = vsel %vm1861_vm9, %v5064_v12, %v5072_v55  ;;  %v2228_v12 = vld [vmem:[%s5087_s18 + $0x60] sm:$0xff]  ;;  %v2229_v15 = vld [vmem:[%s5087_s18 + $0x68] sm:$0xff]  ;;  %v3791_v55 = vld [vmem:[%s4611_s20 + $0x30] sm:$0xff]  }
 0x21f   : > { %1635 = vmatprep.mubr.bf16.mxu1 %v4137_v7  ;;  %v5077_v60 = vpop.permute.xlu1 %1845  ;;  %2294 = vperm.xlu1 %3720, %v2228_v12   ;;  %v5354_v12 = vld [vmem:[%s5229_s21 + $0x68] sm:$0xff] }
 0x221   : > { %v5082_v61 = vpop.permute.xlu0 %1843  ;;  %2299 = vperm.xlu0 %3719, %v2229_v15   ;;  %v5374_v15 = vld [vmem:[%s5229_s21 + $0x78] sm:$0xff] }
 0x222   : > { %v1887_v45 = vsel %vm1861_vm9, %v5082_v61, %v5077_v60 }
 0x223   : > { %v1850_v43 = vpop.permute.xlu1 %1849  ;;  %2304 = vperm.xlu1 %3720, %v2230_v31   ;;  %v5347_v31 = vld [vmem:[%s4623_s24 + $0x68] sm:$0xff] }
 0x224   : > { %1523 = vmatmul.mubr.bf16.vlgmr.msra.gmra.mrb[0].mxu0 %v3785_v57 }
 0x225   : > { %1927 = vmatpush1.bf16.msra.mxu0 %v1862_v17  ;;  %1532 = vmatprep.mubr.bf16.mxu0 %v4137_v7  ;;  %v1848_v20 = vpop.permute.xlu0 %1847  ;;  %v3794_v17 = vld [vmem:[%s4611_s20 + $0x88] sm:$0xff]  }
 0x226   : > { %1636 = vmatmul.mubr.bf16.vlgmr.msra.gmra.mrb[0].mxu1 %v3785_v57  ;;  %1928 = vmatprep.subr.bf16.mxu0 %v1867_v63  ;;  %v1889_v56 = vsel %vm1861_vm9, %v1848_v20, %v1850_v43  ;;  %v1888_v32 = vsel %vm1861_vm9, %v5077_v60, %v1848_v20  ;;  %v3792_v57 = vld [vmem:[%s4611_s20 + $0x38] sm:$0xff]   ;;  %v3793_v60 = vld [vmem:[%s4611_s20 + $0x80] sm:$0xff]   ;;  %v5244_v43 = vld [vmem:[%s5229_s21 + $0x10] sm:$0xff] }
 0x227   : > { %2040 = vmatpush1.bf16.msra.mxu1 %v1864_v3  ;;  %1645 = vmatprep.mubr.bf16.mxu1 %v4137_v7  ;;  %v1854_v41 = vpop.permute.xlu1 %1853  ;;  %v3796_v63 = vld [vmem:[%s4611_s20 + $0x98] sm:$0xff]   ;;  %v3798_v3 = vld [vmem:[%s4611_s20 + $0xa8] sm:$0xff]  }
 0x228   : > { %2041 = vmatprep.subr.bf16.mxu1 %v1869_v10  ;;  %2309 = vperm.xlu0 %3719, %v2231_v53   ;;  %v3800_v10 = vld [vmem:[%s4611_s20 + $0xb8] sm:$0xff]   ;;  %v5324_v53 = vld [vmem:[%s5229_s21 + $0x50] sm:$0xff] }
 0x229   : > { %1929 = vmatpush1.bf16.msra.mxu0 %v1866_v44  ;;  %v1842_v49 = vpop.permute.xlu0 %1841  ;;  %v5232_v44 = vld [vmem:[%s5229_s21] sm:$0xff] }
 0x22a   : > { %1930 = vmatprep.subr.bf16.mxu0 %v1871_v14  ;;  %v1886_v59 = vsel %vm1861_vm9, %v1842_v49, %v5082_v61  ;;  %v3795_v61 = vld [vmem:[%s4611_s20 + $0x90] sm:$0xff]   ;;  %v5226_v14 = vld [vmem:[%s4623_s24] sm:$0xff]  ;;  %s6171_s20 = sld [smem:[#allocation38_spill]] }
 0x22b   : > { %2042 = vmatpush1.bf16.msra.mxu1 %v1868_v19  ;;  %v1858_v27 = vpop.permute.xlu1 %1857  ;;  %v5247_v19 = vld [vmem:[%s4623_s24 + $0x18] sm:$0xff] }
 0x22c   : > { %2043 = vmatprep.subr.bf16.mxu1 %v1873_v33  ;;  %1533 = vmatmul.mubr.bf16.gmra.mrb[4].mxu0 %v3786_v11  ;;  %v5238_v33 = vld [vmem:[%s5229_s21 + $0x8] sm:$0xff] }
 0x22d   : > { %1931 = vmatpush1.bf16.msra.mxu0 %v1870_v23  ;;  %1542 = vmatprep.mubr.bf16.mxu0 %v4137_v7  ;;  %v1856_v21 = vpop.permute.xlu0 %1855 }
 0x22e   : > { %1646 = vmatmul.mubr.bf16.gmra.mrb[4].mxu1 %v3786_v11  ;;  %1932 = vmatprep.subr.bf16.mxu0 %v1875_v54  ;;  %v1891_v22 = vsel %vm1861_vm9, %v1854_v41, %v1856_v21  ;;  %v1892_v46 = vsel %vm1861_vm9, %v1856_v21, %v1858_v27  ;;  %v5235_v11 = vld [vmem:[%s4623_s24 + $0x8] sm:$0xff]  ;;  %v5277_v21 = vld [vmem:[%s4623_s24 + $0x30] sm:$0xff]  ;;  %v5474_v54 = vld [vmem:[%s5229_s21 + $0xc0] sm:$0xff] }
 0x22f   : > { %2044 = vmatpush1.bf16.msra.mxu1 %v1872_v28  ;;  %1655 = vmatprep.mubr.bf16.mxu1 %v4137_v7  ;;  %v1852_v13 = vpop.permute.xlu1 %1851 }
 0x230   : > { %2045 = vmatprep.subr.bf16.mxu1 %v1877_v25  ;;  %v1890_v37 = vsel %vm1861_vm9, %v1852_v13, %v1854_v41  ;;  %v5261_v41 = vld [vmem:[%s4623_s24 + $0x20] sm:$0xff]  ;;  %v5414_v13 = vld [vmem:[%s5229_s21 + $0x98] sm:$0xff]  ;;  %p6172_p11 = scmp.ne.s32.totalorder %s6171_s20, 0 }
 0x231   : > { %1933 = vmatpush1.bf16.msra.mxu0 %v1874_v6  ;;  %v1860_v2 = vpop.permute.xlu0 %1859  ;;  %6051 = vst [vmem:[#allocation40_spill] sm:$0xff] %v5414_v13  ;;  %v5454_v6 = vld [vmem:[%s5229_s21 + $0xb8] sm:$0xff]  ;;  %s6173_s4 = sld [smem:[#allocation25_spill]] (%p6172_p11) }
 0x232   : > { %1934 = vmatprep.subr.bf16.mxu0 %v1879_v40  ;;  %v1893_v34 = vsel %vm1861_vm9, %v1858_v27, %v1860_v2  ;;  %v5294_v2 = vld [vmem:[%s5229_s21 + $0x38] sm:$0xff]  ;;  %v5434_v27 = vld [vmem:[%s5229_s21 + $0xa8] sm:$0xff]  ;;  %6059 = vst [vmem:[#allocation48_spill] sm:$0xff] %v5454_v6  ;;  %v5461_v40 = vld [vmem:[%s4623_s24 + $0xc0] sm:$0xff] }
 0x233   : > { %2046 = vmatpush1.bf16.msra.mxu1 %v1876_v47  ;;  %v5264_v47 = vld [vmem:[%s5229_s21 + $0x20] sm:$0xff]  ;;  %6055 = vst [vmem:[#allocation44_spill] sm:$0xff] %v5434_v27  ;;  %6060 = vst [vmem:[#allocation49_spill] sm:$0xff] %v5461_v40  ;;  %v6063_v27 = vunpack.c.l.bf16 %v5232_v44 }
 0x234   : > { %1543 = vmatmul.mubr.bf16.gmra.mrb[8].mxu0 %v3787_v8  ;;  %2047 = vmatprep.subr.bf16.mxu1 %v1881_v51  ;;  %v5444_v51 = vld [vmem:[%s5229_s21 + $0xb0] sm:$0xff] }
 0x235   : > { %1935 = vmatpush1.bf16.msra.mxu0 %v1878_v5  ;;  %1552 = vmatprep.mubr.bf16.mxu0 %v4137_v7  ;;  %6057 = vst [vmem:[#allocation46_spill] sm:$0xff] %v5444_v51 }
 0x236   : > { %1656 = vmatmul.mubr.bf16.gmra.mrb[8].mxu1 %v3787_v8  ;;  %1936 = vmatprep.subr.bf16.mxu0 %v1883_v16  ;;  %v5267_v8 = vld [vmem:[%s4623_s24 + $0x28] sm:$0xff] }
 0x237   : > { %2048 = vmatpush1.bf16.msra.mxu1 %v1880_v18  ;;  %1665 = vmatprep.mubr.bf16.mxu1 %v4137_v7  ;;  %v5274_v18 = vld [vmem:[%s5229_s21 + $0x28] sm:$0xff]  ;;  %s3335_s22 = sshll.u32 (%p6172_p11), %s6173_s4, 2 }
 0x238   : > { %2049 = vmatprep.subr.bf16.mxu1 %v1885_v24  ;;  %s2930_s5 = ssub.s32 (%p6172_p11), 5, %s3335_s22 }
 0x239   : > { %1937 = vmatpush1.bf16.msra.mxu0 %v1882_v36  ;;  %v5427_v36 = vld [vmem:[%s4623_s24 + $0xa8] sm:$0xff]  ;;  %p2931_p10 = scmp.lt.s32.totalorder (%p6172_p11), %s2930_s5, 4 }
 0x23a   : > { %1938 = vmatprep.subr.bf16.mxu0 %v1887_v45  ;;  %v5287_v45 = vld [vmem:[%s4623_s24 + $0x38] sm:$0xff]  ;;  %6054 = vst [vmem:[#allocation43_spill] sm:$0xff] %v5427_v36 }
 0x23b   : > { %2050 = vmatpush1.bf16.msra.mxu1 %v1884_v48  ;;  %v5421_v48 = vld [vmem:[%s4623_s24 + $0xa0] sm:$0xff] }
 0x23c   : > { %1553 = vmatmul.mubr.bf16.gmra.mrb[12].mxu0 %v3788_v52  ;;  %2051 = vmatprep.subr.bf16.mxu1 %v1889_v56  ;;  %6052 = vst [vmem:[#allocation41_spill] sm:$0xff] %v5421_v48  ;;  %v5437_v56 = vld [vmem:[%s4623_s24 + $0xb0] sm:$0xff] }
 0x23d   : > { %1562 = vmatprep.mubr.bf16.mxu0 %v4137_v7  ;;  %1939 = vmatpush1.bf16.msra.mxu0 %v1886_v59  ;;  %v5424_v59 = vld [vmem:[%s5229_s21 + $0xa0] sm:$0xff]  ;;  %6056 = vst [vmem:[#allocation45_spill] sm:$0xff] %v5437_v56 }
 0x23e   : > { %1666 = vmatmul.mubr.bf16.gmra.mrb[12].mxu1 %v3788_v52  ;;  %1940 = vmatprep.subr.bf16.mxu0 %v1891_v22  ;;  %v5381_v22 = vld [vmem:[%s4623_s24 + $0x80] sm:$0xff]  ;;  %6053 = vst [vmem:[#allocation42_spill] sm:$0xff] %v5424_v59 }
 0x23f   : > { %1675 = vmatprep.mubr.bf16.mxu1 %v4137_v7  ;;  %2052 = vmatpush1.bf16.msra.mxu1 %v1888_v32 }
 0x240   : > { %2053 = vmatprep.subr.bf16.mxu1 %v1893_v34  ;;  %v5394_v34 = vld [vmem:[%s5229_s21 + $0x88] sm:$0xff] }
 0x241   : > { %1941 = vmatpush1.bf16.msra.mxu0 %v1890_v37  ;;  %v5304_v37 = vld [vmem:[%s5229_s21 + $0x40] sm:$0xff] }
 0x243   : > { %2054 = vmatpush1.bf16.msra.mxu1 %v1892_v46  ;;  %v5384_v46 = vld [vmem:[%s5229_s21 + $0x80] sm:$0xff] }
 0x244   : > { %1563 = vmatmul.mubr.bf16.gmra.mrb[16].mxu0 %v3789_v42 }
 0x245   : > { %1572 = vmatprep.mubr.bf16.mxu0 %v4137_v7 }
 0x246   : > { %1676 = vmatmul.mubr.bf16.gmra.mrb[16].mxu1 %v3789_v42  ;;  %v5397_v42 = vld [vmem:[%s4623_s24 + $0x90] sm:$0xff] }
 0x247   : > { %1685 = vmatprep.mubr.bf16.mxu1 %v4137_v7 }
 0x24c   : > { %1573 = vmatmul.mubr.bf16.gmra.mrb[20].mxu0 %v3790_v9 }
 0x24d   : > { %1582 = vmatprep.mubr.bf16.mxu0 %v4137_v7 }
 0x24e   : > { %1686 = vmatmul.mubr.bf16.gmra.mrb[20].mxu1 %v3790_v9 }
 0x24f   : > { %1695 = vmatprep.mubr.bf16.mxu1 %v4137_v7 }
 0x252   : > { %v2240_v28 = vpop.permute.xlu1 %2239 }
 0x254   : > { %1583 = vmatmul.mubr.bf16.gmra.mrb[24].mxu0 %v3791_v55 }
 0x255   : > { %1592 = vmatprep.mubr.bf16.mxu0 %v4137_v7  ;;  %v2235_v58 = vpop.permute.xlu0 %2234 }
 0x256   : > { %1696 = vmatmul.mubr.bf16.gmra.mrb[24].mxu1 %v3791_v55  ;;  %v5327_v55 = vld [vmem:[%s4623_s24 + $0x58] sm:$0xff] }
 0x257   : > { %1705 = vmatprep.mubr.bf16.mxu1 %v4137_v7 }
 0x25c   : > { %1593 = vmatmul.mubr.bf16.gmra.mrb[28].mxu0 %v3792_v57 }
 0x25d   : > { %1958 = vmatprep.mubr.bf16.mxu0 %v4137_v7 }
 0x25e   : > { %1706 = vmatmul.mubr.bf16.gmra.mrb[28].mxu1 %v3792_v57  ;;  %v5341_v57 = vld [vmem:[%s4623_s24 + $0x60] sm:$0xff] }
 0x25f   : > { %2071 = vmatprep.mubr.bf16.mxu1 %v4137_v7 }
 0x264   : > { %1959 = vmatmul.mubr.bf16.vlgmr.msra.gmra.mrb[0].mxu0 %v3793_v60 }
 0x265   : > { %1968 = vmatprep.mubr.bf16.mxu0 %v4137_v7 }
 0x266   : > { %2072 = vmatmul.mubr.bf16.vlgmr.msra.gmra.mrb[0].mxu1 %v3793_v60  ;;  %v5344_v60 = vld [vmem:[%s5229_s21 + $0x60] sm:$0xff] }
 0x267   : > { %2081 = vmatprep.mubr.bf16.mxu1 %v4137_v7 }
 0x26c   : > { %1969 = vmatmul.mubr.bf16.gmra.mrb[4].mxu0 %v3794_v17 }
 0x26d   : > { %1978 = vmatprep.mubr.bf16.mxu0 %v4137_v7 }
 0x26e   : > { %2082 = vmatmul.mubr.bf16.gmra.mrb[4].mxu1 %v3794_v17  ;;  %v5364_v17 = vld [vmem:[%s5229_s21 + $0x70] sm:$0xff] }
 0x26f   : > { %2091 = vmatprep.mubr.bf16.mxu1 %v4137_v7 }
 0x274   : > { %1979 = vmatmul.mubr.bf16.gmra.mrb[8].mxu0 %v3795_v61 }
 0x275   : > { %1988 = vmatprep.mubr.bf16.mxu0 %v4137_v7 }
 0x276   : > { %2092 = vmatmul.mubr.bf16.gmra.mrb[8].mxu1 %v3795_v61  ;;  %v5407_v61 = vld [vmem:[%s4623_s24 + $0x98] sm:$0xff] }
 0x277   : > { %2101 = vmatprep.mubr.bf16.mxu1 %v4137_v7 }
 0x27c   : > { %1989 = vmatmul.mubr.bf16.gmra.mrb[12].mxu0 %v3796_v63 }
 0x27d   : > { %1998 = vmatprep.mubr.bf16.mxu0 %v4137_v7 }
 0x27e   : > { %2102 = vmatmul.mubr.bf16.gmra.mrb[12].mxu1 %v3796_v63  ;;  %v5334_v63 = vld [vmem:[%s5229_s21 + $0x58] sm:$0xff] }
 0x27f   : > { %2111 = vmatprep.mubr.bf16.mxu1 %v4137_v7 }
 0x284   : > { %1999 = vmatmul.mubr.bf16.gmra.mrb[16].mxu0 %v3797_v0 }
 0x285   : > { %2008 = vmatprep.mubr.bf16.mxu0 %v4137_v7 }
 0x286   : > { %2112 = vmatmul.mubr.bf16.gmra.mrb[16].mxu1 %v3797_v0  ;;  %v5367_v0 = vld [vmem:[%s4623_s24 + $0x78] sm:$0xff] }
 0x287   : > { %2121 = vmatprep.mubr.bf16.mxu1 %v4137_v7 }
 0x28c   : > { %2009 = vmatmul.mubr.bf16.gmra.mrb[20].mxu0 %v3798_v3 }
 0x28d   : > { %2018 = vmatprep.mubr.bf16.mxu0 %v4137_v7 }
 0x28e   : > { %2122 = vmatmul.mubr.bf16.gmra.mrb[20].mxu1 %v3798_v3  ;;  %v5447_v3 = vld [vmem:[%s4623_s24 + $0xb8] sm:$0xff] }
 0x28f   : > { %2131 = vmatprep.mubr.bf16.mxu1 %v4137_v7  ;;  %6058 = vst [vmem:[#allocation47_spill] sm:$0xff] %v5447_v3 }
 0x294   : > { %2019 = vmatmul.mubr.bf16.gmra.mrb[24].mxu0 %v3799_v4 }
 0x295   : > { %2028 = vmatprep.mubr.bf16.mxu0 %v4137_v7 }
 0x296   : > { %2132 = vmatmul.mubr.bf16.gmra.mrb[24].mxu1 %v3799_v4  ;;  %v5357_v4 = vld [vmem:[%s4623_s24 + $0x70] sm:$0xff] }
 0x297   : > { %2141 = vmatprep.mubr.bf16.mxu1 %v4137_v7  ;;  %v5241_v7 = vld [vmem:[%s4623_s24 + $0x10] sm:$0xff] }
 0x29c   : > { %2029 = vmatmul.mubr.bf16.gmra.mrb[28].mxu0 %v3800_v10 }
 0x29e   : > { %2142 = vmatmul.mubr.bf16.gmra.mrb[28].mxu1 %v3800_v10  ;;  %v5404_v10 = vld [vmem:[%s5229_s21 + $0x90] sm:$0xff] }
 0x337   : > { %v1960_v32 = vpop.f32.mrb[0].mxu0 }
 0x338   : > { %v2312_v52 = vadd.f32 %v2235_v58, %v1960_v32  ;;  %v1962_v25 = vpop.f32.mrb[1].mxu0  ;;  %v6061_v32 = vunpack.c.l.bf16 %v5226_v14 }
 0x339   : > { %v2313_v20 = vadd.f32 %v2235_v58, %v1962_v25  ;;  %v2073_v16 = vpop.f32.mrb[0].mxu1  ;;  %v1964_v49 = vpop.f32.mrb[2].mxu0  ;;  %v6062_v25 = vunpack.c.h.bf16 %v5226_v14 }
 0x33a   : > { %v2472_v56 = vadd.f32 %v6061_v32, %v2312_v52  ;;  %v2314_v24 = vadd.f32 %v2235_v58, %v2073_v16  ;;  %v2316_v51 = vadd.f32 %v2240_v28, %v1964_v49  ;;  %v2075_v5 = vpop.f32.mrb[1].mxu1  ;;  %v1966_v36 = vpop.f32.mrb[3].mxu0  ;;  %v6064_v16 = vunpack.c.l.bf16 %v5235_v11 }
 0x33b   : > { %v2473_v3 = vadd.f32 %v6062_v25, %v2313_v20  ;;  %v2315_v59 = vadd.f32 %v2235_v58, %v2075_v5  ;;  %v2317_v48 = vadd.f32 %v2240_v28, %v1966_v36  ;;  %v2077_v13 = vpop.f32.mrb[2].mxu1  ;;  %v6065_v52 = vunpack.c.l.bf16 %v5241_v7 }
 0x33c   : > { %v2632_v40 = vadd.f32 %v6063_v27, %v2472_v56  ;;  %v2474_v49 = vadd.f32 %v6064_v16, %v2314_v24  ;;  %v2318_v23 = vadd.f32 %v2240_v28, %v2077_v13  ;;  %v2079_v14 = vpop.f32.mrb[3].mxu1  ;;  %v6066_v20 = vunpack.c.h.bf16 %v5232_v44  ;;  %v2245_v27 = vpop.permute.xlu1 %2244 }
 0x33d   : > { %v2476_v32 = vadd.f32 %v6065_v52, %v2316_v51  ;;  %v6067_v36 = vunpack.c.h.bf16 %v5235_v11  ;;  %v6068_v25 = vunpack.c.h.bf16 %v5241_v7  ;;  %v2319_v6 = vadd.f32 %v2240_v28, %v2079_v14 }
 0x33e   : > { %v2633_v5 = vadd.f32 %v6066_v20, %v2473_v3  ;;  %v6069_v56 = vunpack.c.l.bf16 %v5238_v33  ;;  %v6070_v16 = vunpack.c.l.bf16 %v5244_v43  ;;  %v6071_v13 = vunpack.c.l.bf16 %v5247_v19  ;;  %v5514_v20 = vld [vmem:[%s5229_s21 + $0xc8] sm:$0xff] }
 0x33f   : > { %v2475_v58 = vadd.f32 %v6067_v36, %v2315_v59  ;;  %v2477_v9 = vadd.f32 %v6068_v25, %v2317_v48  ;;  %v2460_v44 = vunpack.c.l.bf16 %v5486_v29  ;;  %v6072_v11 = vunpack.c.h.bf16 %v5238_v33 }
 0x340   : > { %v2634_v24 = vadd.f32 %v6069_v56, %v2474_v49  ;;  %v2636_v51 = vadd.f32 %v6070_v16, %v2476_v32  ;;  %v2478_v52 = vadd.f32 %v6071_v13, %v2318_v23  ;;  %v3356_v3 = vpack.c.bf16 %v2633_v5, %v2632_v40  ;;  %v1970_v49 = vpop.f32.mrb[4].mxu0  ;;  %v2250_v56 = vpop.permute.xlu0 %2249 }
 0x341   : > { %v2635_v59 = vadd.f32 %v6072_v11, %v2475_v58  ;;  %v6073_v7 = vunpack.c.h.bf16 %v5244_v43  ;;  %v6074_v48 = vunpack.c.h.bf16 %v5247_v19  ;;  %v6075_v32 = vunpack.c.l.bf16 %v5254_v26  ;;  %v1972_v23 = vpop.f32.mrb[5].mxu0  ;;  %v2083_v58 = vpop.f32.mrb[4].mxu1 }
 0x342   : > { %v2320_v25 = vadd.f32 %v2245_v27, %v1970_v49  ;;  %v2617_v40 = vunpack.c.h.bf16 %v5474_v54  ;;  %v2459_v33 = vunpack.c.h.bf16 %v5468_v30  ;;  %2888 = vst [vmem:[%s5521_s17] sm:$0xff] %v3356_v3  ;;  %v2321_v5 = vadd.f32 %v2245_v27, %v1972_v23  ;;  %v1974_v16 = vpop.f32.mrb[6].mxu0 }
 0x343   : > { %v2637_v28 = vadd.f32 %v6073_v7, %v2477_v9  ;;  %v2479_v14 = vadd.f32 %v6074_v48, %v2319_v6  ;;  %v2638_v36 = vadd.f32 %v6075_v32, %v2478_v52  ;;  %v3357_v43 = vpack.c.bf16 %v2635_v59, %v2634_v24  ;;  %v2085_v48 = vpop.f32.mrb[5].mxu1  ;;  %v1976_v49 = vpop.f32.mrb[7].mxu0 }
 0x344   : > { %v6076_v6 = vunpack.c.h.bf16 %v5254_v26  ;;  %v6077_v13 = vunpack.c.l.bf16 %v5261_v41  ;;  %v2322_v11 = vadd.f32 %v2245_v27, %v2083_v58  ;;  %v2324_v7 = vadd.f32 %v2250_v56, %v1974_v16 }
 0x345   : > { %v3358_v19 = vpack.c.bf16 %v2637_v28, %v2636_v51  ;;  %v2618_v32 = vunpack.c.l.bf16 %v5514_v20  ;;  %2889 = vst [vmem:[%s5521_s17 + $0x8] sm:$0xff] %v3357_v43  ;;  %v6078_v26 = vunpack.c.h.bf16 %v5261_v41  ;;  %v2323_v3 = vadd.f32 %v2245_v27, %v2085_v48  ;;  %v2087_v28 = vpop.f32.mrb[6].mxu1 }
 0x346   : > { %v2639_v9 = vadd.f32 %v6076_v6, %v2479_v14  ;;  %v2480_v52 = vadd.f32 %v6077_v13, %v2320_v25  ;;  %v2325_v59 = vadd.f32 %v2250_v56, %v1976_v49  ;;  %v6079_v14 = vunpack.c.l.bf16 %v5264_v47  ;;  %v5550_v49 = vld [vmem:[%s4623_s24 + $0xd8] sm:$0xff] }
 0x347   : > { %2890 = vst [vmem:[%s5521_s17 + $0x10] sm:$0xff] %v3358_v19  ;;  %v2481_v51 = vadd.f32 %v6078_v26, %v2321_v5  ;;  %v6080_v23 = vunpack.c.l.bf16 %v5267_v8  ;;  %v6081_v58 = vunpack.c.l.bf16 %v5277_v21  ;;  %v2326_v43 = vadd.f32 %v2250_v56, %v2087_v28  ;;  %v2089_v19 = vpop.f32.mrb[7].mxu1 }
 0x348   : > { %v3359_v24 = vpack.c.bf16 %v2639_v9, %v2638_v36  ;;  %v2640_v25 = vadd.f32 %v6079_v14, %v2480_v52  ;;  %v6082_v36 = vunpack.c.h.bf16 %v5264_v47  ;;  %v6083_v9 = vunpack.c.h.bf16 %v5267_v8  ;;  %v5547_v52 = vld [vmem:[%s5229_s21 + $0xd0] sm:$0xff] }
 0x349   : > { %v2482_v6 = vadd.f32 %v6080_v23, %v2322_v11  ;;  %v2484_v16 = vadd.f32 %v6081_v58, %v2324_v7  ;;  %v6084_v5 = vunpack.c.h.bf16 %v5277_v21  ;;  %v2327_v48 = vadd.f32 %v2250_v56, %v2089_v19  ;;  %v1980_v58 = vpop.f32.mrb[8].mxu0 }
 0x34a   : > { %2891 = vst [vmem:[%s5521_s17 + $0x18] sm:$0xff] %v3359_v24  ;;  %v2641_v41 = vadd.f32 %v6082_v36, %v2481_v51  ;;  %v2483_v27 = vadd.f32 %v6083_v9, %v2323_v3  ;;  %v6085_v11 = vunpack.c.l.bf16 %v5274_v18  ;;  %v6086_v26 = vunpack.c.l.bf16 %v5284_v39  ;;  %v2260_v36 = vpop.permute.xlu0 %2259 }
 0x34b   : > { %v2485_v13 = vadd.f32 %v6084_v5, %v2325_v59  ;;  %v6087_v47 = vunpack.c.l.bf16 %v5287_v45  ;;  %v2461_v8 = vunpack.c.h.bf16 %v5486_v29  ;;  %v6088_v21 = vunpack.c.h.bf16 %v5274_v18 }
 0x34c   : > { %v2642_v7 = vadd.f32 %v6085_v11, %v2482_v6  ;;  %v2644_v24 = vadd.f32 %v6086_v26, %v2484_v16  ;;  %v3360_v3 = vpack.c.bf16 %v2641_v41, %v2640_v25  ;;  %v6089_v59 = vunpack.c.h.bf16 %v5284_v39  ;;  %v2255_v6 = vpop.permute.xlu1 %2254 }
 0x34d   : > { %v2486_v51 = vadd.f32 %v6087_v47, %v2326_v43  ;;  %v2643_v56 = vadd.f32 %v6088_v21, %v2483_v27  ;;  %v6090_v14 = vunpack.c.h.bf16 %v5287_v45  ;;  %v6091_v19 = vunpack.c.l.bf16 %v5294_v2  ;;  %v1982_v43 = vpop.f32.mrb[9].mxu0 }
 0x34e   : > { %v2645_v28 = vadd.f32 %v6089_v59, %v2485_v13  ;;  %v2328_v9 = vadd.f32 %v2255_v6, %v1980_v58  ;;  %v2620_v25 = vunpack.c.l.bf16 %v5547_v52  ;;  %v2462_v18 = vunpack.c.l.bf16 %v5550_v49  ;;  %2892 = vst [vmem:[%s5521_s17 + $0x20] sm:$0xff] %v3360_v3  ;;  %v2093_v13 = vpop.f32.mrb[8].mxu1 }
 0x34f   : > { %v2487_v23 = vadd.f32 %v6090_v14, %v2327_v48  ;;  %v2646_v16 = vadd.f32 %v6091_v19, %v2486_v51  ;;  %v3361_v39 = vpack.c.bf16 %v2643_v56, %v2642_v7  ;;  %v6092_v45 = vunpack.c.h.bf16 %v5294_v2  ;;  %v1984_v48 = vpop.f32.mrb[10].mxu0  ;;  %v2095_v21 = vpop.f32.mrb[9].mxu1 }
 0x350   : > { %v3362_v41 = vpack.c.bf16 %v2645_v28, %v2644_v24  ;;  %v2329_v5 = vadd.f32 %v2255_v6, %v1982_v43  ;;  %v6093_v11 = vunpack.c.l.bf16 %v5301_v35  ;;  %v2330_v47 = vadd.f32 %v2255_v6, %v2093_v13  ;;  %v1986_v59 = vpop.f32.mrb[11].mxu0  ;;  %v2097_v28 = vpop.f32.mrb[10].mxu1 }
 0x351   : > { %v2647_v27 = vadd.f32 %v6092_v45, %v2487_v23  ;;  %v2332_v51 = vadd.f32 %v2260_v36, %v1984_v48  ;;  %v2619_v14 = vunpack.c.h.bf16 %v5514_v20  ;;  %2893 = vst [vmem:[%s5521_s17 + $0x28] sm:$0xff] %v3361_v39  ;;  %v6094_v2 = vunpack.c.h.bf16 %v5301_v35  ;;  %v2099_v39 = vpop.f32.mrb[11].mxu1 }
 0x352   : > { %v2488_v26 = vadd.f32 %v6093_v11, %v2328_v9  ;;  %2894 = vst [vmem:[%s5521_s17 + $0x30] sm:$0xff] %v3362_v41  ;;  %v2331_v3 = vadd.f32 %v2255_v6, %v2095_v21  ;;  %v2333_v56 = vadd.f32 %v2260_v36, %v1986_v59  ;;  %v6095_v23 = vunpack.c.l.bf16 %v5304_v37  ;;  %v5593_v11 = vld [vmem:[%s5229_s21 + $0xd8] sm:$0xff] }
 0x353   : > { %v3363_v7 = vpack.c.bf16 %v2647_v27, %v2646_v16  ;;  %v2489_v24 = vadd.f32 %v6094_v2, %v2329_v5  ;;  %v6096_v19 = vunpack.c.l.bf16 %v5307_v38  ;;  %v6097_v43 = vunpack.c.l.bf16 %v5317_v1 }
 0x354   : > { %v2648_v58 = vadd.f32 %v6095_v23, %v2488_v26  ;;  %v2334_v13 = vadd.f32 %v2260_v36, %v2097_v28  ;;  %v6098_v16 = vunpack.c.h.bf16 %v5304_v37  ;;  %v6099_v35 = vunpack.c.h.bf16 %v5307_v38  ;;  %v2265_v38 = vpop.permute.xlu1 %2264  ;;  %v1990_v23 = vpop.f32.mrb[12].mxu0 }
 0x355   : > { %v2490_v9 = vadd.f32 %v6096_v19, %v2330_v47  ;;  %v2492_v45 = vadd.f32 %v6097_v43, %v2332_v51  ;;  %2895 = vst [vmem:[%s5521_s17 + $0x38] sm:$0xff] %v3363_v7  ;;  %v6100_v27 = vunpack.c.h.bf16 %v5317_v1  ;;  %v2335_v48 = vadd.f32 %v2260_v36, %v2099_v39  ;;  %v2270_v19 = vpop.permute.xlu0 %2269 }
 0x356   : > { %v2649_v41 = vadd.f32 %v6098_v16, %v2489_v24  ;;  %v2491_v6 = vadd.f32 %v6099_v35, %v2331_v3  ;;  %v6101_v26 = vunpack.c.l.bf16 %v5314_v62  ;;  %v6102_v51 = vunpack.c.l.bf16 %v5324_v53  ;;  %v2103_v35 = vpop.f32.mrb[12].mxu1 }
 0x357   : > { %v2493_v5 = vadd.f32 %v6100_v27, %v2333_v56  ;;  %v6103_v59 = vunpack.c.l.bf16 %v5327_v55  ;;  %v2463_v7 = vunpack.c.h.bf16 %v5550_v49  ;;  %v6104_v1 = vunpack.c.h.bf16 %v5314_v62 }
 0x358   : > { %v2650_v47 = vadd.f32 %v6101_v26, %v2490_v9  ;;  %v2652_v21 = vadd.f32 %v6102_v51, %v2492_v45  ;;  %v3364_v2 = vpack.c.bf16 %v2649_v41, %v2648_v58  ;;  %v6105_v36 = vunpack.c.h.bf16 %v5324_v53  ;;  %v2105_v51 = vpop.f32.mrb[13].mxu1 }
 0x359   : > { %v2494_v37 = vadd.f32 %v6103_v59, %v2334_v13  ;;  %v2651_v24 = vadd.f32 %v6104_v1, %v2491_v6  ;;  %v6106_v56 = vunpack.c.h.bf16 %v5327_v55  ;;  %v6107_v9 = vunpack.c.l.bf16 %v5334_v63  ;;  %v1992_v13 = vpop.f32.mrb[13].mxu0 }
 0x35a   : > { %v2653_v3 = vadd.f32 %v6105_v36, %v2493_v5  ;;  %v2336_v45 = vadd.f32 %v2265_v38, %v1990_v23  ;;  %v2621_v39 = vunpack.c.h.bf16 %v5547_v52  ;;  %v2622_v62 = vunpack.c.l.bf16 %v5593_v11  ;;  %2896 = vst [vmem:[%s5521_s17 + $0x40] sm:$0xff] %v3364_v2  ;;  %v1994_v6 = vpop.f32.mrb[14].mxu0  ;;  %v5623_v36 = vld [vmem:[%s4623_s24 + $0xe0] sm:$0xff] }
 0x35b   : > { %v2495_v28 = vadd.f32 %v6106_v56, %v2335_v48  ;;  %v2654_v43 = vadd.f32 %v6107_v9, %v2494_v37  ;;  %v3365_v58 = vpack.c.bf16 %v2651_v24, %v2650_v47  ;;  %v6108_v16 = vunpack.c.h.bf16 %v5334_v63  ;;  %v1996_v59 = vpop.f32.mrb[15].mxu0  ;;  %v2107_v24 = vpop.f32.mrb[14].mxu1 }
 0x35c   : > { %v3366_v53 = vpack.c.bf16 %v2653_v3, %v2652_v21  ;;  %v2337_v41 = vadd.f32 %v2265_v38, %v1992_v13  ;;  %v6109_v27 = vunpack.c.l.bf16 %v5341_v57  ;;  %v2338_v48 = vadd.f32 %v2265_v38, %v2103_v35  ;;  %v5639_v35 = vld [vmem:[%s4623_s24 + $0xe8] sm:$0xff] }
 0x35d   : > { %v2655_v55 = vadd.f32 %v6108_v16, %v2495_v28  ;;  %v2340_v26 = vadd.f32 %v2270_v19, %v1994_v6  ;;  %v2623_v37 = vunpack.c.h.bf16 %v5593_v11  ;;  %2897 = vst [vmem:[%s5521_s17 + $0x48] sm:$0xff] %v3365_v58  ;;  %v6110_v63 = vunpack.c.h.bf16 %v5341_v57 }
 0x35e   : > { %v2496_v5 = vadd.f32 %v6109_v27, %v2336_v45  ;;  %2898 = vst [vmem:[%s5521_s17 + $0x50] sm:$0xff] %v3366_v53  ;;  %v2339_v2 = vadd.f32 %v2265_v38, %v2105_v51  ;;  %v2341_v1 = vadd.f32 %v2270_v19, %v1996_v59  ;;  %v6111_v3 = vunpack.c.l.bf16 %v5344_v60 }
 0x35f   : > { %v3367_v47 = vpack.c.bf16 %v2655_v55, %v2654_v43  ;;  %v2497_v21 = vadd.f32 %v6110_v63, %v2337_v41  ;;  %v6112_v28 = vunpack.c.l.bf16 %v5347_v31  ;;  %v6113_v9 = vunpack.c.l.bf16 %v5357_v4  ;;  %v2109_v43 = vpop.f32.mrb[15].mxu1 }
 0x360   : > { %v2656_v56 = vadd.f32 %v6111_v3, %v2496_v5  ;;  %v2342_v13 = vadd.f32 %v2270_v19, %v2107_v24  ;;  %v6114_v57 = vunpack.c.h.bf16 %v5344_v60  ;;  %v6115_v58 = vunpack.c.h.bf16 %v5347_v31  ;;  %v2275_v31 = vpop.permute.xlu1 %2274  ;;  %v5655_v24 = vld [vmem:[%s5229_s21 + $0xe0] sm:$0xff]  ;;  %v2280_v3 = vpop.permute.xlu0 %2279 }
 0x361   : > { %v2498_v23 = vadd.f32 %v6112_v28, %v2338_v48  ;;  %v2500_v45 = vadd.f32 %v6113_v9, %v2340_v26  ;;  %2899 = vst [vmem:[%s5521_s17 + $0x58] sm:$0xff] %v3367_v47  ;;  %v6116_v16 = vunpack.c.h.bf16 %v5357_v4  ;;  %v2343_v41 = vadd.f32 %v2270_v19, %v2109_v43 }
 0x362   : > { %v2657_v38 = vadd.f32 %v6114_v57, %v2497_v21  ;;  %v2499_v53 = vadd.f32 %v6115_v58, %v2339_v2  ;;  %v6117_v6 = vunpack.c.l.bf16 %v5354_v12  ;;  %v6118_v5 = vunpack.c.l.bf16 %v5364_v17 }
 0x363   : > { %v2501_v55 = vadd.f32 %v6116_v16, %v2341_v1  ;;  %v6119_v26 = vunpack.c.l.bf16 %v5367_v0  ;;  %v2464_v51 = vunpack.c.l.bf16 %v5623_v36  ;;  %v6120_v4 = vunpack.c.h.bf16 %v5354_v12  ;;  %v2000_v1 = vpop.f32.mrb[16].mxu0 }
 0x364   : > { %v2658_v27 = vadd.f32 %v6117_v6, %v2498_v23  ;;  %v2660_v48 = vadd.f32 %v6118_v5, %v2500_v45  ;;  %v3368_v59 = vpack.c.bf16 %v2657_v38, %v2656_v56  ;;  %v6121_v19 = vunpack.c.h.bf16 %v5364_v17  ;;  %v2002_v45 = vpop.f32.mrb[17].mxu0  ;;  %v2113_v38 = vpop.f32.mrb[16].mxu1 }
 0x365   : > { %v2502_v60 = vadd.f32 %v6119_v26, %v2342_v13  ;;  %v2659_v47 = vadd.f32 %v6120_v4, %v2499_v53  ;;  %v6122_v21 = vunpack.c.h.bf16 %v5367_v0  ;;  %v6123_v28 = vunpack.c.l.bf16 %v5374_v15  ;;  %v2004_v58 = vpop.f32.mrb[18].mxu0  ;;  %v2115_v6 = vpop.f32.mrb[17].mxu1 }
 0x366   : > { %v2661_v63 = vadd.f32 %v6121_v19, %v2501_v55  ;;  %v2344_v9 = vadd.f32 %v2275_v31, %v2000_v1  ;;  %v2465_v56 = vunpack.c.h.bf16 %v5623_v36  ;;  %v2466_v12 = vunpack.c.l.bf16 %v5639_v35  ;;  %2900 = vst [vmem:[%s5521_s17 + $0x60] sm:$0xff] %v3368_v59  ;;  %v2006_v5 = vpop.f32.mrb[19].mxu0  ;;  %v2117_v4 = vpop.f32.mrb[18].mxu1 }
 0x367   : > { %v2503_v2 = vadd.f32 %v6122_v21, %v2343_v41  ;;  %v2662_v23 = vadd.f32 %v6123_v28, %v2502_v60  ;;  %v3369_v17 = vpack.c.bf16 %v2659_v47, %v2658_v27  ;;  %v6124_v0 = vunpack.c.h.bf16 %v5374_v15  ;;  %v5672_v47 = vld [vmem:[%s4623_s24 + $0xf0] sm:$0xff] }
 0x368   : > { %v3370_v13 = vpack.c.bf16 %v2661_v63, %v2660_v48  ;;  %v2345_v57 = vadd.f32 %v2275_v31, %v2002_v45  ;;  %v6125_v53 = vunpack.c.l.bf16 %v5381_v22  ;;  %v2346_v55 = vadd.f32 %v2275_v31, %v2113_v38  ;;  %v2119_v45 = vpop.f32.mrb[19].mxu1 }
 0x369   : > { %v2663_v43 = vadd.f32 %v6124_v0, %v2503_v2  ;;  %v2348_v41 = vadd.f32 %v2280_v3, %v2004_v58  ;;  %v2624_v26 = vunpack.c.l.bf16 %v5655_v24  ;;  %2901 = vst [vmem:[%s5521_s17 + $0x68] sm:$0xff] %v3369_v17  ;;  %v6126_v15 = vunpack.c.h.bf16 %v5381_v22 }
 0x36a   : > { %v2504_v16 = vadd.f32 %v6125_v53, %v2344_v9  ;;  %2902 = vst [vmem:[%s5521_s17 + $0x70] sm:$0xff] %v3370_v13  ;;  %v2347_v60 = vadd.f32 %v2275_v31, %v2115_v6  ;;  %v2349_v59 = vadd.f32 %v2280_v3, %v2006_v5  ;;  %v6127_v19 = vunpack.c.l.bf16 %v5384_v46 }
 0x36b   : > { %v3371_v27 = vpack.c.bf16 %v2663_v43, %v2662_v23  ;;  %v2505_v48 = vadd.f32 %v6126_v15, %v2345_v57  ;;  %v6128_v21 = vunpack.c.l.bf16 %v5387_v50  ;;  %v6129_v1 = vunpack.c.l.bf16 %v5397_v42 }
 0x36c   : > { %v2664_v63 = vadd.f32 %v6127_v19, %v2504_v16  ;;  %v2350_v9 = vadd.f32 %v2280_v3, %v2117_v4  ;;  %v6130_v22 = vunpack.c.h.bf16 %v5384_v46  ;;  %v6131_v23 = vunpack.c.h.bf16 %v5387_v50  ;;  %v6139_v4 = vld [vmem:[#allocation40_spill] sm:$0xff] }
 0x36d   : > { %v2506_v2 = vadd.f32 %v6128_v21, %v2346_v55  ;;  %v2508_v28 = vadd.f32 %v6129_v1, %v2348_v41  ;;  %2903 = vst [vmem:[%s5521_s17 + $0x78] sm:$0xff] %v3371_v27  ;;  %v6132_v13 = vunpack.c.h.bf16 %v5397_v42  ;;  %v2351_v43 = vadd.f32 %v2280_v3, %v2119_v45  ;;  %v2285_v41 = vpop.permute.xlu1 %2284 }
 0x36e   : > { %v2665_v31 = vadd.f32 %v6130_v22, %v2505_v48  ;;  %v2507_v17 = vadd.f32 %v6131_v23, %v2347_v60  ;;  %v6133_v57 = vunpack.c.l.bf16 %v5394_v34  ;;  %v6134_v58 = vunpack.c.l.bf16 %v5404_v10  ;;  %v2010_v48 = vpop.f32.mrb[20].mxu0  ;;  %v5701_v60 = vld [vmem:[%s5229_s21 + $0xe8] sm:$0xff]  ;;  %v2123_v22 = vpop.f32.mrb[20].mxu1 }
 0x36f   : > { %v2509_v0 = vadd.f32 %v6132_v13, %v2349_v59  ;;  %v6135_v16 = vunpack.c.l.bf16 %v5407_v61  ;;  %v2468_v46 = vunpack.c.l.bf16 %v5672_v47  ;;  %v6136_v50 = vunpack.c.h.bf16 %v5394_v34  ;;  %v2290_v59 = vpop.permute.xlu0 %2289  ;;  %v2012_v1 = vpop.f32.mrb[21].mxu0  ;;  %v6142_v23 = vld [vmem:[#allocation41_spill] sm:$0xff] }
 0x370   : > { %v2666_v38 = vadd.f32 %v6133_v57, %v2506_v2  ;;  %v2668_v53 = vadd.f32 %v6134_v58, %v2508_v28  ;;  %v3372_v6 = vpack.c.bf16 %v2665_v31, %v2664_v63  ;;  %v6137_v42 = vunpack.c.h.bf16 %v5404_v10  ;;  %v2014_v31 = vpop.f32.mrb[22].mxu0  ;;  %v2125_v57 = vpop.f32.mrb[21].mxu1 }
 0x371   : > { %v2510_v55 = vadd.f32 %v6135_v16, %v2350_v9  ;;  %v2667_v5 = vadd.f32 %v6136_v50, %v2507_v17  ;;  %v6138_v27 = vunpack.c.h.bf16 %v5407_v61  ;;  %v6140_v19 = vunpack.c.l.bf16 %v6139_v4  ;;  %v2016_v58 = vpop.f32.mrb[23].mxu0 }
 0x372   : > { %v2669_v3 = vadd.f32 %v6137_v42, %v2509_v0  ;;  %v2352_v2 = vadd.f32 %v2285_v41, %v2010_v48  ;;  %v2625_v63 = vunpack.c.h.bf16 %v5655_v24  ;;  %v2467_v34 = vunpack.c.h.bf16 %v5639_v35  ;;  %2904 = vst [vmem:[%s5521_s17 + $0x80] sm:$0xff] %v3372_v6  ;;  %v6145_v42 = vld [vmem:[#allocation42_spill] sm:$0xff] }
 0x373   : > { %v2511_v15 = vadd.f32 %v6138_v27, %v2351_v43  ;;  %v2670_v21 = vadd.f32 %v6140_v19, %v2510_v55  ;;  %v3373_v10 = vpack.c.bf16 %v2667_v5, %v2666_v38  ;;  %v6141_v61 = vunpack.c.h.bf16 %v6139_v4  ;;  %v2127_v5 = vpop.f32.mrb[22].mxu1  ;;  %v6149_v19 = vld [vmem:[#allocation45_spill] sm:$0xff] }
 0x374   : > { %v3374_v28 = vpack.c.bf16 %v2669_v3, %v2668_v53  ;;  %v2353_v45 = vadd.f32 %v2285_v41, %v2012_v1  ;;  %v6143_v17 = vunpack.c.l.bf16 %v6142_v23  ;;  %v2354_v0 = vadd.f32 %v2285_v41, %v2123_v22 }
 0x375   : > { %v2671_v9 = vadd.f32 %v6141_v61, %v2511_v15  ;;  %v2356_v43 = vadd.f32 %v2290_v59, %v2014_v31  ;;  %v2626_v16 = vunpack.c.l.bf16 %v5701_v60  ;;  %2905 = vst [vmem:[%s5521_s17 + $0x88] sm:$0xff] %v3373_v10  ;;  %v6144_v53 = vunpack.c.h.bf16 %v6142_v23  ;;  %v6147_v15 = vld [vmem:[#allocation43_spill] sm:$0xff]  ;;  %v5731_v23 = vld [vmem:[%s5229_s21 + $0xf0] sm:$0xff] }
 0x376   : > { %v2512_v13 = vadd.f32 %v6143_v17, %v2352_v2  ;;  %2906 = vst [vmem:[%s5521_s17 + $0x90] sm:$0xff] %v3374_v28  ;;  %v2355_v6 = vadd.f32 %v2285_v41, %v2125_v57  ;;  %v2357_v50 = vadd.f32 %v2290_v59, %v2016_v58  ;;  %v6146_v3 = vunpack.c.l.bf16 %v6145_v42  ;;  %v2129_v28 = vpop.f32.mrb[23].mxu1  ;;  %v5734_v17 = vld [vmem:[%s4623_s24 + $0xf8] sm:$0xff]  ;;  %v6156_v57 = vld [vmem:[#allocation46_spill] sm:$0xff] }
 0x377   : > { %v3375_v38 = vpack.c.bf16 %v2671_v9, %v2670_v21  ;;  %v2513_v55 = vadd.f32 %v6144_v53, %v2353_v45  ;;  %v6148_v48 = vunpack.c.l.bf16 %v6147_v15  ;;  %v6150_v2 = vunpack.c.l.bf16 %v6149_v19  ;;  %v6158_v53 = vld [vmem:[#allocation47_spill] sm:$0xff] }
 0x378   : > { %v2672_v27 = vadd.f32 %v6146_v3, %v2512_v13  ;;  %v2358_v10 = vadd.f32 %v2290_v59, %v2127_v5  ;;  %v6151_v21 = vunpack.c.h.bf16 %v6145_v42  ;;  %v6152_v9 = vunpack.c.h.bf16 %v6147_v15  ;;  %v6154_v13 = vld [vmem:[#allocation44_spill] sm:$0xff]  ;;  %v2295_v42 = vpop.permute.xlu1 %2294 }
 0x379   : > { %v2514_v4 = vadd.f32 %v6148_v48, %v2354_v0  ;;  %v2516_v1 = vadd.f32 %v6150_v2, %v2356_v43  ;;  %2907 = vst [vmem:[%s5521_s17 + $0x98] sm:$0xff] %v3375_v38  ;;  %v6153_v45 = vunpack.c.h.bf16 %v6149_v19  ;;  %v2359_v31 = vadd.f32 %v2290_v59, %v2129_v28  ;;  %v2020_v2 = vpop.f32.mrb[24].mxu0  ;;  %v2300_v28 = vpop.permute.xlu0 %2299 }
 0x37a   : > { %v2673_v61 = vadd.f32 %v6151_v21, %v2513_v55  ;;  %v2515_v41 = vadd.f32 %v6152_v9, %v2355_v6  ;;  %v6155_v0 = vunpack.c.l.bf16 %v6154_v13  ;;  %v6157_v58 = vunpack.c.l.bf16 %v6156_v57  ;;  %v6163_v21 = vld [vmem:[#allocation48_spill] sm:$0xff] }
 0x37b   : > { %v2517_v22 = vadd.f32 %v6153_v45, %v2357_v50  ;;  %v6159_v55 = vunpack.c.l.bf16 %v6158_v53  ;;  %v2469_v6 = vunpack.c.h.bf16 %v5672_v47  ;;  %v6160_v59 = vunpack.c.h.bf16 %v6154_v13 }
 0x37c   : > { %v2674_v43 = vadd.f32 %v6155_v0, %v2514_v4  ;;  %v2676_v38 = vadd.f32 %v6157_v58, %v2516_v1  ;;  %v3376_v3 = vpack.c.bf16 %v2673_v61, %v2672_v27  ;;  %v6161_v15 = vunpack.c.h.bf16 %v6156_v57  ;;  %v2133_v57 = vpop.f32.mrb[24].mxu1 }
 0x37d   : > { %v2518_v5 = vadd.f32 %v6159_v55, %v2358_v10  ;;  %v2675_v50 = vadd.f32 %v6160_v59, %v2515_v41  ;;  %v6162_v19 = vunpack.c.h.bf16 %v6158_v53  ;;  %v6164_v1 = vunpack.c.l.bf16 %v6163_v21  ;;  %v2022_v10 = vpop.f32.mrb[25].mxu0  ;;  %v6166_v53 = vld [vmem:[#allocation49_spill] sm:$0xff] }
 0x37e   : > { %v2677_v48 = vadd.f32 %v6161_v15, %v2517_v22  ;;  %v2360_v45 = vadd.f32 %v2295_v42, %v2020_v2  ;;  %v2628_v0 = vunpack.c.l.bf16 %v5731_v23  ;;  %v2470_v27 = vunpack.c.l.bf16 %v5734_v17  ;;  %2908 = vst [vmem:[%s5521_s17 + $0xa0] sm:$0xff] %v3376_v3  ;;  %v2024_v58 = vpop.f32.mrb[26].mxu0 }
 0x37f   : > { %v2519_v4 = vadd.f32 %v6162_v19, %v2359_v31  ;;  %v2678_v9 = vadd.f32 %v6164_v1, %v2518_v5  ;;  %v3377_v61 = vpack.c.bf16 %v2675_v50, %v2674_v43  ;;  %v6165_v22 = vunpack.c.h.bf16 %v6163_v21  ;;  %v2135_v19 = vpop.f32.mrb[25].mxu1  ;;  %v2026_v2 = vpop.f32.mrb[27].mxu0 }
 0x380   : > { %v3378_v41 = vpack.c.bf16 %v2677_v48, %v2676_v38  ;;  %v2361_v31 = vadd.f32 %v2295_v42, %v2022_v10  ;;  %v6167_v55 = vunpack.c.l.bf16 %v6166_v53  ;;  %v2362_v59 = vadd.f32 %v2295_v42, %v2133_v57 }
 0x381   : > { %v2679_v13 = vadd.f32 %v6165_v22, %v2519_v4  ;;  %v2364_v15 = vadd.f32 %v2300_v28, %v2024_v58  ;;  %v2627_v1 = vunpack.c.h.bf16 %v5701_v60  ;;  %2909 = vst [vmem:[%s5521_s17 + $0xa8] sm:$0xff] %v3377_v61  ;;  %v6168_v38 = vunpack.c.h.bf16 %v6166_v53  ;;  %v2137_v4 = vpop.f32.mrb[26].mxu1 }
 0x382   : > { %v2520_v5 = vadd.f32 %v6167_v55, %v2360_v45  ;;  %2910 = vst [vmem:[%s5521_s17 + $0xb0] sm:$0xff] %v3378_v41  ;;  %v2363_v50 = vadd.f32 %v2295_v42, %v2135_v19  ;;  %v2365_v48 = vadd.f32 %v2300_v28, %v2026_v2  ;;  %v6169_v21 = vunpack.c.l.bf16 %v5474_v54  ;;  %v2139_v61 = vpop.f32.mrb[27].mxu1 }
 0x383   : > { %v3379_v43 = vpack.c.bf16 %v2679_v13, %v2678_v9  ;;  %v2521_v3 = vadd.f32 %v6168_v38, %v2361_v31  ;;  %v6170_v10 = vunpack.c.l.bf16 %v5468_v30  ;;  %v2524_v57 = vadd.f32 %v2460_v44, %v2364_v15  ;;  %v2567_v31 = vld [vmem:[%s5229_s21 + $0xf8] sm:$0xff] }
 0x384   : > { %v2680_v45 = vadd.f32 %v6169_v21, %v2520_v5  ;;  %v2366_v58 = vadd.f32 %v2300_v28, %v2137_v4  ;;  %v2523_v42 = vadd.f32 %v2459_v33, %v2363_v50  ;;  %v2525_v41 = vadd.f32 %v2461_v8, %v2365_v48  ;;  %v2030_v8 = vpop.f32.mrb[28].mxu0 }
 0x385   : > { %v2522_v22 = vadd.f32 %v6170_v10, %v2362_v59  ;;  %2911 = vst [vmem:[%s5521_s17 + $0xb8] sm:$0xff] %v3379_v43  ;;  %v2681_v9 = vadd.f32 %v2617_v40, %v2521_v3  ;;  %v2367_v13 = vadd.f32 %v2300_v28, %v2139_v61  ;;  %v2684_v44 = vadd.f32 %v2620_v25, %v2524_v57  ;;  %v2305_v40 = vpop.permute.xlu1 %2304  ;;  %v2310_v28 = vpop.permute.xlu0 %2309 }
 0x386   : > { %v2526_v55 = vadd.f32 %v2462_v18, %v2366_v58  ;;  %v2471_v54 = vunpack.c.h.bf16 %v5734_v17  ;;  %v2683_v29 = vadd.f32 %v2619_v14, %v2523_v42  ;;  %v2685_v33 = vadd.f32 %v2621_v39, %v2525_v41  ;;  %v2032_v18 = vpop.f32.mrb[29].mxu0 }
 0x387   : > { %v2682_v53 = vadd.f32 %v2618_v32, %v2522_v22  ;;  %v3380_v30 = vpack.c.bf16 %v2681_v9, %v2680_v45  ;;  %v2527_v32 = vadd.f32 %v2463_v7, %v2367_v13  ;;  %v2368_v5 = vadd.f32 %v2305_v40, %v2030_v8  ;;  %v2143_v7 = vpop.f32.mrb[28].mxu1  ;;  %v2034_v39 = vpop.f32.mrb[30].mxu0 }
 0x388   : > { %v2686_v25 = vadd.f32 %v2622_v62, %v2526_v55  ;;  %v2629_v59 = vunpack.c.h.bf16 %v5731_v23  ;;  %v2630_v15 = vunpack.c.l.bf16 %v2567_v31  ;;  %v3382_v14 = vpack.c.bf16 %v2685_v33, %v2684_v44  ;;  %v2145_v43 = vpop.f32.mrb[29].mxu1  ;;  %v2036_v38 = vpop.f32.mrb[31].mxu0 }
 0x389   : > { %2912 = vst [vmem:[%s5521_s17 + $0xc0] sm:$0xff] %v3380_v30  ;;  %v3381_v20 = vpack.c.bf16 %v2683_v29, %v2682_v53  ;;  %v2687_v52 = vadd.f32 %v2623_v37, %v2527_v32  ;;  %v2369_v49 = vadd.f32 %v2305_v40, %v2032_v18  ;;  %v2528_v19 = vadd.f32 %v2464_v51, %v2368_v5  ;;  %v2147_v4 = vpop.f32.mrb[30].mxu1 }
 0x38a   : > { %v2370_v62 = vadd.f32 %v2305_v40, %v2143_v7  ;;  %v2372_v2 = vadd.f32 %v2310_v28, %v2034_v39  ;;  %v2631_v3 = vunpack.c.h.bf16 %v2567_v31  ;;  %2914 = vst [vmem:[%s5521_s17 + $0xd0] sm:$0xff] %v3382_v14  ;;  %v2371_v11 = vadd.f32 %v2305_v40, %v2145_v43  ;;  %v2149_v22 = vpop.f32.mrb[31].mxu1 }
 0x38b   : > { %2913 = vst [vmem:[%s5521_s17 + $0xc8] sm:$0xff] %v3381_v20  ;;  %v3383_v50 = vpack.c.bf16 %v2687_v52, %v2686_v25  ;;  %v2529_v48 = vadd.f32 %v2465_v56, %v2369_v49  ;;  %v2373_v37 = vadd.f32 %v2310_v28, %v2036_v38  ;;  %v2688_v21 = vadd.f32 %v2624_v26, %v2528_v19 }
 0x38c   : > { %v2530_v51 = vadd.f32 %v2466_v12, %v2370_v62  ;;  %v2532_v45 = vadd.f32 %v2468_v46, %v2372_v2  ;;  %v2374_v10 = vadd.f32 %v2310_v28, %v2147_v4  ;;  %v2531_v56 = vadd.f32 %v2467_v34, %v2371_v11 }
 0x38d   : > { %2915 = vst [vmem:[%s5521_s17 + $0xd8] sm:$0xff] %v3383_v50  ;;  %v2689_v36 = vadd.f32 %v2625_v63, %v2529_v48  ;;  %v2533_v26 = vadd.f32 %v2469_v6, %v2373_v37  ;;  %v2375_v57 = vadd.f32 %v2310_v28, %v2149_v22 }
 0x38e   : > { %v2690_v12 = vadd.f32 %v2626_v16, %v2530_v51  ;;  %v2692_v46 = vadd.f32 %v2628_v0, %v2532_v45  ;;  %v2534_v24 = vadd.f32 %v2470_v27, %v2374_v10  ;;  %v2691_v35 = vadd.f32 %v2627_v1, %v2531_v56 }
 0x38f   : > { %v3384_v63 = vpack.c.bf16 %v2689_v36, %v2688_v21  ;;  %v2693_v34 = vadd.f32 %v2629_v59, %v2533_v26  ;;  %v2535_v47 = vadd.f32 %v2471_v54, %v2375_v57  ;;  %2927 = sbr.rel (!%p6172_p11) target bundleno = 953 (0x3b9), region = 68 }
 0x390   : > { %v2694_v58 = vadd.f32 %v2630_v15, %v2534_v24  ;;  %v3385_v6 = vpack.c.bf16 %v2691_v35, %v2690_v12 }
 0x391   : > { %2916 = vst [vmem:[%s5521_s17 + $0xe0] sm:$0xff] %v3384_v63  ;;  %v3386_v61 = vpack.c.bf16 %v2693_v34, %v2692_v46  ;;  %v2695_v9 = vadd.f32 %v2631_v3, %v2535_v47 }
 0x392   : > { %2917 = vst [vmem:[%s5521_s17 + $0xe8] sm:$0xff] %v3385_v6 }
 0x393   : > { %2918 = vst [vmem:[%s5521_s17 + $0xf0] sm:$0xff] %v3386_v61  ;;  %v3387_v16 = vpack.c.bf16 %v2695_v9, %v2694_v58 }
 0x395   : > { %2919 = vst [vmem:[%s5521_s17 + $0xf8] sm:$0xff] %v3387_v16 }
 0x396   : > { %s6222_s5 = smov (!%p2931_p10, %s2930_s5), 4 }
 0x397   : > { %s5837_s24 = sshll.u32 %s6222_s5, 10 }
 0x398   : > { %s2935_s3 = ssub.s32 4096, %s5837_s24 }
 0x399   : > { %2936 = vsyncadd %s5829_s9, %s2935_s3  ;;  %s6174_s16 = sld [smem:[#allocation24_spill]]  ;;  %s6175_s11 = sld [smem:[#allocation26_spill]] }
 0x39a   : > { %p3337_p13 = scmp.ne.s32.totalorder %s5837_s24, 0  ;;  %s3340_s19 = sshll.u32 %s6222_s5, 2 }
 0x39b   : > { %s2946_s27 = sshll.u32 %s5521_s17, 4  ;;  %s6176_s20 = sld [smem:[#allocation54_spill]]  ;;  %s5846_s27 = int_to_ptr.vmem [resolvable:$true] %s2946_s27 }
 0x39c   : > { %s3914_s3 = scalar_lea.vmem %s5846_s27, %s5837_s24 }
 0x39d   : > { %p3915_p1 = scmp.ne.s32.totalorder %s5846_s27, %s3914_s3 }
 0x39f   : > { %s3525_s8 = smul.u32 80, %s6174_s16  ;;  %p3916_p2 = pnand %p3915_p1, %p3337_p13 }
 0x3a0   : > { %s3526_s10 = smul.u32 160, %s6175_s11  ;;  %s4139_s16 = smov [#allocation11]  }
 0x3a1   : > { %s2939_s7 = sadd.s32 %s3525_s8, %s3335_s22  ;;  %p3917_p0 = pneg %p3916_p2 }
 0x3a2   : > { %s2941_s13 = sadd.s32 %s3526_s10, %s2939_s7  ;;  %s3918_s22 = sshll.u32 %s4139_s16, 4  ;;  %s3919_s22 = int_to_ptr.vmem [resolvable:$false] %s3918_s22 }
 0x3a3   : > { %s3339_s30 = sshll.u32 %s2941_s13, 6  ;;  %s3920_s17 = scalar_lea.vmem %s3919_s22, 8192 }
 0x3a4   : > { %s5851_s4 = scalar_lea.hbm %s6176_s20, %s3339_s30  ;;  %p3921_p7 = scmp.lt.s32.totalorder %s5846_s27, %s3919_s22 }
 0x3a5   : > { %p3922_p4 = scmp.lt.s32.totalorder %s3920_s17, %s3914_s3 }
 0x3a7   : > { %p3923_p5 = por %p3922_p4, %p3921_p7 }
 0x3a9   : > { %p3924_p12 = pnand %p3923_p5, %p3917_p0 }
 0x3ab   : > { %3927 = shalt.err (!%p3924_p12)
}
 0x3ac   : > { %s3928_s11 = scalar_lea.hbm %s5851_s4, %s5837_s24  ;;  %s3932_s7 = scalar_lea.hbm %s6176_s20, 20480 }
 0x3ad   : > { %p3929_p8 = scmp.ne.s32.totalorder %s5851_s4, %s3928_s11  ;;  %p3933_p9 = scmp.lt.u32.totalorder %s5851_s4, %s6176_s20 }
 0x3ae   : > { %p3934_p11 = scmp.lt.u32.totalorder %s3932_s7, %s3928_s11  ;;  %p3936_p1 = scmp.lt.u32.totalorder %s3928_s11, %s5851_s4 }
 0x3af   : > { %p3930_p3 = pnand %p3929_p8, %p3337_p13 }
 0x3b0   : > { %p3935_p10 = por %p3934_p11, %p3933_p9 }
 0x3b1   : > { %p3931_p6 = pneg %p3930_p3 }
 0x3b2   : > { %p3937_p2 = por %p3936_p1, %p3935_p10 }
 0x3b4   : > { %p3938_p0 = pnand %p3937_p2, %p3931_p6 }
 0x3b6   : > { %3941 = shalt.err (!%p3938_p0)
}
 0x3b7   : > { %s4140_s18 = smov 256   ;;  %s4141_s21 = smov 320  }
 0x3b8   : > { %2952 = dma.vmem_to_hbm [thread:$0]  (%p3337_p13), %s5846_s27, %s5837_s24, %s5851_s4, %s5829_s9, %s4140_s18, %s4141_s21, %s3340_s19  }
 0x3b9 PF: > { %s6177_s3 = sld [smem:[#allocation20_spill]]  ;;  %p3546_p7 = scmp.ge.s32.totalorder %s4114_s15, 2 }
 0x3ba   : > { %s6178_s16 = sld [smem:[#allocation39_spill]] }
 0x3bf   : > { %s2961_s22 = sand.u32 1, %s6177_s3  }
 0x3c0   : > { %p6179_p4 = scmp.ne.s32.totalorder %s6178_s16, 0  ;;  %s2962_s17 = scalar_lea.sflag [#allocation4], %s2961_s22 }
 0x3c2   : > { %p3543_p5 = pnand %p3546_p7, %p6179_p4 }
 0x3c4   : > { %4035 = dma.done.wait (!%p3543_p5), %s2962_s17, 4096  }
 0x3c5   : > { %4037 = vsyncadd (!%p3543_p5), %s2962_s17, 4294963200  ;;  %s28_s15 = sadd.s32 1, %s4114_s15   ;;  %s6181_s21 = sld [smem:[#allocation21_spill]] }
 0x3c6   : > { %p5885_p12 = scmp.ge.s32.totalorder %s28_s15, 10   ;;  %s6182_s9 = sld [smem:[#allocation36_spill]] }
 0x3c7   : > { %s6183_s5 = sld [smem:[#allocation34_spill]]  ;;  %s6184_s19 = sld [smem:[#allocation33_spill]] }
 0x3c8   : > { %s6185_s30 = sld [smem:[#allocation22_spill]]  ;;  %s6186_s7 = sld [smem:[#allocation23_spill]] }
 0x3c9   : > { %s6187_s8 = sld [smem:[#allocation32_spill]]  ;;  %s6188_s10 = sld [smem:[#allocation27_spill]] }
 0x3ca   : > { %s6189_s4 = sld [smem:[#allocation28_spill]]  ;;  %s6190_s13 = sld [smem:[#allocation29_spill]] }
 0x3cb   : > { %s6191_s22 = smov %s4050_s23  ;;  %s6192_s18 = sld [smem:[#allocation31_spill]] }
 0x3cc   : > { %s6193_s23 = smov %s6182_s9  ;;  %s6194_s24 = smov %s4058_s25 }
 0x3cd   : > { %s6196_s25 = smov %s4062_s26  ;;  %s6197_s26 = smov %s6183_s5 }
 0x3ce   : > { %s6198_s27 = smov %s4070_s28  ;;  %s6199_s28 = smov %s4074_s29 }
 0x3cf   : > { %s6200_s29 = smov %s6184_s19  ;;  %s6201_s9 = smov %s4102_s12 }
 0x3d0   : > { %s6202_s11 = smov %s4110_s14  ;;  %s6203_s12 = smov %s6189_s4 }
 0x3d1   : > { %s6204_s14 = smov %s6192_s18  ;;  %27 = sbr.rel (!%p5885_p12) target bundleno = 23 (0x17), region = 147 }
 0x3d8   :  { %2967 = vsyncpa [#allocation3], 1 }
 0x3d9   :  { %2969 = vsyncpa [#allocation3 + $0x1], 1 }
 0x3da   :  { %2970 = vsyncpa [#allocation6], 1 }
 0x3db   :  { %2972 = vsyncpa [#allocation6 + $0x1], 1 }
 0x3dc   :  { %2973 = vsyncpa [#allocation9], 1 }
 0x3dd   :  { %2975 = vsyncpa [#allocation9 + $0x1], 1 }
 0x3de   :  { %2976 = vsyncpa [#allocation4], 1 }
 0x3df   :  { %2978 = vsyncpa [#allocation4 + $0x1], 1 }

</bundles_post_ra>
